<compile_context>
chip_gen: v7x
topology: tpu7x:2x2x1
jax: 0.10.0
libtpu: 0.0.40
codegen_flags: <defaults>
</compile_context>

<pallas_src>
import jax
import jax.numpy as jnp
from jax.experimental import pallas as pl
from jax.experimental.pallas import tpu as pltpu

EPS = 1e-5
VMEM_LIMIT_BYTES = 48 * 1024 * 1024   # explicit; leaves headroom on v7x (64 MiB)


# --------------------------------------------------------------------------
# Kernel 1: folded BN1 (scale/shift) + SiLU + Conv1x1 (channel matmul, bf16 MXU)
# --------------------------------------------------------------------------
def bn_silu_conv1x1_kernel(x_ref,        # (1, TH, W, Cin) f32
                           scale1_ref,   # (1, Cin)        f32   g1 * rsqrt(var1+eps)
                           shift1_ref,   # (1, Cin)        f32   be1 - mean1*scale1
                           w1_ref,       # (Cin, C1)       bf16
                           bc1_ref,      # (1, C1)         f32
                           a_ref):       # (1, TH, W, C1)  f32
    TH, W, Cin = x_ref.shape[1], x_ref.shape[2], x_ref.shape[3]
    C1 = w1_ref.shape[1]

    x = x_ref[0].reshape(TH * W, Cin)
    h = x * scale1_ref[...] + shift1_ref[...]            # folded BN1 (1 FMA-ish)
    h = h * jax.nn.sigmoid(h)                            # SiLU (EUP), f32
    a = jnp.dot(h.astype(jnp.bfloat16), w1_ref[...],
                preferred_element_type=jnp.float32) + bc1_ref[...]
    a_ref[0] = a.reshape(TH, W, C1)


# --------------------------------------------------------------------------
# Kernel 2: folded BN2 + SiLU + Conv3x3 (pad=1) with fused horizontal taps
# --------------------------------------------------------------------------
def bn_silu_conv3x3_kernel(a_ref,        # (1, H, W, C1)   f32
                           scale2_ref,   # (1, C1)         f32
                           shift2_ref,   # (1, C1)         f32
                           w3_ref,       # (3, 3*C1, Cg)   bf16  (ky-major, kx fused into K)
                           bc3_ref,      # (1, Cg)         f32
                           z_ref):       # (1, H, W, Cg)   f32
    H, W, C1 = a_ref.shape[1], a_ref.shape[2], a_ref.shape[3]
    Cg = w3_ref.shape[2]

    a = a_ref[0]                                          # (H, W, C1)
    b = a * scale2_ref[0] + shift2_ref[0]                 # folded BN2
    b = b * jax.nn.sigmoid(b)                             # SiLU, f32
    bb = b.astype(jnp.bfloat16)                           # MXU operand

    # Fuse the 3 horizontal taps (kx = 0,1,2) channel-wise -> K = 3*C1 slab.
    zero_col = jnp.zeros((H, 1, C1), jnp.bfloat16)
    left = jnp.concatenate([zero_col, bb[:, :W - 1, :]], axis=1)   # column w-1
    right = jnp.concatenate([bb[:, 1:, :], zero_col], axis=1)      # column w+1
    slab = jnp.concatenate([left, bb, right], axis=-1)             # (H, W, 3*C1)

    # Vertical taps (ky = 0,1,2) are in-block shifts (no halo: full H per block).
    zero_row = jnp.zeros((1, W, 3 * C1), jnp.bfloat16)
    up = jnp.concatenate([zero_row, slab[:H - 1]], axis=0)         # row h-1 (ky=0)
    down = jnp.concatenate([slab[1:], zero_row], axis=0)           # row h+1 (ky=2)

    # 3 matmuls with K = 3*C1 (instead of 9 with K = C1); acc init from 1st dot.
    acc = jnp.dot(up.reshape(H * W, 3 * C1), w3_ref[0],
                  preferred_element_type=jnp.float32)
    acc = acc + jnp.dot(slab.reshape(H * W, 3 * C1), w3_ref[1],
                        preferred_element_type=jnp.float32)
    acc = acc + jnp.dot(down.reshape(H * W, 3 * C1), w3_ref[2],
                        preferred_element_type=jnp.float32)
    z = acc + bc3_ref[...]
    z_ref[0] = z.reshape(H, W, Cg)


# --------------------------------------------------------------------------
# Wrapper: NCHW in/out, training-mode BN stats as XLA reductions, dense concat
# --------------------------------------------------------------------------
def dense_layer_forward(x_nchw, params):
    """x_nchw: (N, Cin, H, W) f32 -> (N, Cin+growth, H, W) f32."""
    g1, be1, w1, bc1, g2, be2, w3p, bc3 = params
    N, Cin, H, W = x_nchw.shape
    C1 = w1.shape[1]
    Cg = w3p.shape[2]

    x = jnp.transpose(x_nchw, (0, 2, 3, 1)).astype(jnp.float32)   # NHWC

    # ---- BN1 training-mode batch stats (biased var, two-pass) --------------
    mean1 = jnp.mean(x, axis=(0, 1, 2))
    var1 = jnp.var(x, axis=(0, 1, 2))
    scale1 = (g1[0] * jax.lax.rsqrt(var1 + EPS)).reshape(1, Cin)
    shift1 = (be1[0] - mean1 * scale1[0]).reshape(1, Cin)

    # ---- Kernel 1: tiled over (batch, H-row blocks) -------------------------
    TH = 8 if H % 8 == 0 else H
    a = pl.pallas_call(
        bn_silu_conv1x1_kernel,
        out_shape=jax.ShapeDtypeStruct((N, H, W, C1), jnp.float32),
        grid=(N, H // TH),
        in_specs=[
            pl.BlockSpec((1, TH, W, Cin), lambda n, h: (n, h, 0, 0)),
            pl.BlockSpec((1, Cin), lambda n, h: (0, 0)),
            pl.BlockSpec((1, Cin), lambda n, h: (0, 0)),
            pl.BlockSpec((Cin, C1), lambda n, h: (0, 0)),
            pl.BlockSpec((1, C1), lambda n, h: (0, 0)),
        ],
        out_specs=pl.BlockSpec((1, TH, W, C1), lambda n, h: (n, h, 0, 0)),
        compiler_params=pltpu.CompilerParams(
            dimension_semantics=("parallel", "parallel"),
            vmem_limit_bytes=VMEM_LIMIT_BYTES),
    )(x, scale1, shift1, w1.astype(jnp.bfloat16), bc1)

    # ---- BN2 training-mode batch stats on the conv1x1 output ----------------
    mean2 = jnp.mean(a, axis=(0, 1, 2))
    var2 = jnp.var(a, axis=(0, 1, 2))
    scale2 = (g2[0] * jax.lax.rsqrt(var2 + EPS)).reshape(1, C1)
    shift2 = (be2[0] - mean2 * scale2[0]).reshape(1, C1)

    # ---- Kernel 2: tiled over batch (full image per block, no halo) ---------
    z = pl.pallas_call(
        bn_silu_conv3x3_kernel,
        out_shape=jax.ShapeDtypeStruct((N, H, W, Cg), jnp.float32),
        grid=(N,),
        in_specs=[
            pl.BlockSpec((1, H, W, C1), lambda n: (n, 0, 0, 0)),
            pl.BlockSpec((1, C1), lambda n: (0, 0)),
            pl.BlockSpec((1, C1), lambda n: (0, 0)),
            pl.BlockSpec((3, 3 * C1, Cg), lambda n: (0, 0, 0)),
            pl.BlockSpec((1, Cg), lambda n: (0, 0)),
        ],
        out_specs=pl.BlockSpec((1, H, W, Cg), lambda n: (n, 0, 0, 0)),
        compiler_params=pltpu.CompilerParams(
            dimension_semantics=("parallel",),
            vmem_limit_bytes=VMEM_LIMIT_BYTES),
    )(a, scale2, shift2, w3p.astype(jnp.bfloat16), bc3)

    # ---- dense concat in the wrapper (keeps kernel output lane-clean) -------
    z_nchw = jnp.transpose(z, (0, 3, 1, 2))
    return jnp.concatenate([x_nchw, z_nchw], axis=1)


# --------------------------------------------------------------------------
# Params + pure-JAX f32 reference (PyTorch DenseLayer in train mode)
# --------------------------------------------------------------------------
def make_params(key, input_dim, growth_rate):
    c1 = 4 * growth_rate
    ks = jax.random.split(key, 8)
    g1 = 1.0 + 0.1 * jax.random.normal(ks[0], (1, input_dim), jnp.float32)
    be1 = 0.1 * jax.random.normal(ks[1], (1, input_dim), jnp.float32)
    w1 = 0.2 * jax.random.normal(ks[2], (input_dim, c1), jnp.float32)
    bc1 = 0.1 * jax.random.normal(ks[3], (1, c1), jnp.float32)
    g2 = 1.0 + 0.1 * jax.random.normal(ks[4], (1, c1), jnp.float32)
    be2 = 0.1 * jax.random.normal(ks[5], (1, c1), jnp.float32)
    w3_hwio = 0.1 * jax.random.normal(ks[6], (3, 3, c1, growth_rate), jnp.float32)
    bc3 = 0.1 * jax.random.normal(ks[7], (1, growth_rate), jnp.float32)
    # Pack the 3x3 weights as (ky, kx*C1 + cin, cout): kx taps fused into K.
    w3_packed = w3_hwio.reshape(3, 3 * c1, growth_rate)
    return (g1, be1, w1, bc1, g2, be2, w3_packed, bc3), w3_hwio


def reference_forward(x_nchw, params, w3_hwio):
    g1, be1, w1, bc1, g2, be2, _, bc3 = params
    x = jnp.transpose(x_nchw, (0, 2, 3, 1))
    m1 = x.mean(axis=(0, 1, 2)); v1 = x.var(axis=(0, 1, 2))
    h = (x - m1) * jax.lax.rsqrt(v1 + EPS) * g1[0] + be1[0]
    h = h * jax.nn.sigmoid(h)
    a = jnp.einsum('nhwc,cd->nhwd', h, w1) + bc1[0]
    m2 = a.mean(axis=(0, 1, 2)); v2 = a.var(axis=(0, 1, 2))
    a = (a - m2) * jax.lax.rsqrt(v2 + EPS) * g2[0] + be2[0]
    a = a * jax.nn.sigmoid(a)
    z = jax.lax.conv_general_dilated(
        a, w3_hwio, window_strides=(1, 1), padding='SAME',
        dimension_numbers=('NHWC', 'HWIO', 'NHWC')) + bc3[0]
    out = jnp.concatenate([x, z], axis=-1)
    return jnp.transpose(out, (0, 3, 1, 2))


if __name__ == "__main__":
    key = jax.random.PRNGKey(0)
    kx, kp = jax.random.split(key)

    N, input_dim, growth_rate, H, W = 2, 4, 4, 16, 16
    x = jax.random.normal(kx, (N, input_dim, H, W), jnp.float32)   # NCHW input

    params, w3_hwio = make_params(kp, input_dim, growth_rate)

    y = jax.jit(dense_layer_forward)(x, params)
    y = jax.block_until_ready(y)

    assert y.shape == (N, input_dim + growth_rate, H, W), y.shape

    # f32 reference; tolerance accounts for bf16 MXU operands (f32 accumulate).
    y_ref = reference_forward(x, params, w3_hwio)
    assert jnp.allclose(y, y_ref, atol=5e-2, rtol=5e-2), \
        float(jnp.max(jnp.abs(y - y_ref)))

    print("KERNEL_OK")
</pallas_src>

<mosaic_0001>
module attributes {stable_mosaic.version = 11 : i64} {
  func.func @bn_silu_conv1x1_kernel(%arg0: i32, %arg1: i32, %arg2: memref<1x8x16x4xf32, #tpu.memory_space<vmem>>, %arg3: memref<1x4xf32, #tpu.memory_space<vmem>>, %arg4: memref<1x4xf32, #tpu.memory_space<vmem>>, %arg5: memref<4x16xbf16, #tpu.memory_space<vmem>>, %arg6: memref<1x16xf32, #tpu.memory_space<vmem>>, %arg7: memref<1x8x16x16xf32, #tpu.memory_space<vmem>>) attributes {dimension_semantics = [#tpu.dimension_semantics<parallel>, #tpu.dimension_semantics<parallel>], iteration_bounds = array<i64: 2, 2>, scalar_prefetch = 0 : i64, scratch_operands = 0 : i64, tpu.core_type = #tpu.core_type<tc>, window_params = [{transform_indices = @transform_0, window_bounds = array<i64: 1, 8, 16, 4>}, {pipeline_mode = #tpu.pipeline_mode<synchronous>, transform_indices = @transform_1, window_bounds = array<i64: 1, 4>}, {pipeline_mode = #tpu.pipeline_mode<synchronous>, transform_indices = @transform_2, window_bounds = array<i64: 1, 4>}, {pipeline_mode = #tpu.pipeline_mode<synchronous>, transform_indices = @transform_3, window_bounds = array<i64: 4, 16>}, {pipeline_mode = #tpu.pipeline_mode<synchronous>, transform_indices = @transform_4, window_bounds = array<i64: 1, 16>}, {transform_indices = @transform_5, window_bounds = array<i64: 1, 8, 16, 16>}]} {
    %c0 = arith.constant 0 : index
    %c0_0 = arith.constant 0 : index
    %c0_1 = arith.constant 0 : index
    %c0_2 = arith.constant 0 : index
    %0 = vector.load %arg2[%c0, %c0_0, %c0_1, %c0_2] : memref<1x8x16x4xf32, #tpu.memory_space<vmem>>, vector<1x8x16x4xf32>
    %1 = vector.shape_cast %0 : vector<1x8x16x4xf32> to vector<8x16x4xf32>
    %2 = vector.shape_cast %1 : vector<8x16x4xf32> to vector<128x4xf32>
    %c0_3 = arith.constant 0 : index
    %c0_4 = arith.constant 0 : index
    %3 = vector.load %arg3[%c0_3, %c0_4] : memref<1x4xf32, #tpu.memory_space<vmem>>, vector<1x4xf32>
    %4 = vector.broadcast %3 : vector<1x4xf32> to vector<128x4xf32>
    %5 = arith.mulf %2, %4 : vector<128x4xf32>
    %c0_5 = arith.constant 0 : index
    %c0_6 = arith.constant 0 : index
    %6 = vector.load %arg4[%c0_5, %c0_6] : memref<1x4xf32, #tpu.memory_space<vmem>>, vector<1x4xf32>
    %7 = vector.broadcast %6 : vector<1x4xf32> to vector<128x4xf32>
    %8 = arith.addf %5, %7 : vector<128x4xf32>
    %9 = arith.negf %8 : vector<128x4xf32>
    %10 = math.exp %9 : vector<128x4xf32>
    %cst = arith.constant 1.000000e+00 : f32
    %11 = vector.broadcast %cst : f32 to vector<128x4xf32>
    %12 = arith.addf %11, %10 : vector<128x4xf32>
    %13 = arith.divf %11, %12 : vector<128x4xf32>
    %14 = arith.mulf %8, %13 : vector<128x4xf32>
    %15 = arith.truncf %14 : vector<128x4xf32> to vector<128x4xbf16>
    %c0_7 = arith.constant 0 : index
    %c0_8 = arith.constant 0 : index
    %16 = vector.load %arg5[%c0_7, %c0_8] : memref<4x16xbf16, #tpu.memory_space<vmem>>, vector<4x16xbf16>
    %cst_9 = arith.constant dense<0.000000e+00> : vector<128x16xf32>
    %17 = tpu.matmul %15, %16, %cst_9 {dimension_numbers = #tpu.dot_dimension_numbers<[1], [0], [0], [1], [0, 0, 1, 1], [], []>} : vector<128x4xbf16>, vector<4x16xbf16>, vector<128x16xf32> -> vector<128x16xf32>
    %c0_10 = arith.constant 0 : index
    %c0_11 = arith.constant 0 : index
    %18 = vector.load %arg6[%c0_10, %c0_11] : memref<1x16xf32, #tpu.memory_space<vmem>>, vector<1x16xf32>
    %19 = vector.broadcast %18 : vector<1x16xf32> to vector<128x16xf32>
    %20 = arith.addf %17, %19 : vector<128x16xf32>
    %21 = vector.shape_cast %20 : vector<128x16xf32> to vector<8x16x16xf32>
    %c0_12 = arith.constant 0 : index
    %c0_13 = arith.constant 0 : index
    %c0_14 = arith.constant 0 : index
    %c0_15 = arith.constant 0 : index
    %22 = vector.load %arg7[%c0_12, %c0_13, %c0_14, %c0_15] : memref<1x8x16x16xf32, #tpu.memory_space<vmem>>, vector<1x8x16x16xf32>
    %23 = vector.shape_cast %22 : vector<1x8x16x16xf32> to vector<8x16x16xf32>
    %24 = vector.shape_cast %21 : vector<8x16x16xf32> to vector<1x8x16x16xf32>
    tpu.vector_store %arg7[%c0_12, %c0_13, %c0_14, %c0_15], %24 {strides = array<i32>} : memref<1x8x16x16xf32, #tpu.memory_space<vmem>>, vector<1x8x16x16xf32>,
    return
  }
  func.func @transform_0(%arg0: i32, %arg1: i32) -> (i32, i32, i32, i32) {
    %c0_i32 = arith.constant 0 : i32
    %c0_i32_0 = arith.constant 0 : i32
    %c0_i32_1 = arith.constant 0 : i32
    return %arg0, %arg1, %c0_i32, %c0_i32_0 : i32, i32, i32, i32
  }
  func.func @transform_1(%arg0: i32, %arg1: i32) -> (i32, i32) {
    %c0_i32 = arith.constant 0 : i32
    %c0_i32_0 = arith.constant 0 : i32
    %c0_i32_1 = arith.constant 0 : i32
    return %c0_i32, %c0_i32_0 : i32, i32
  }
  func.func @transform_2(%arg0: i32, %arg1: i32) -> (i32, i32) {
    %c0_i32 = arith.constant 0 : i32
    %c0_i32_0 = arith.constant 0 : i32
    %c0_i32_1 = arith.constant 0 : i32
    return %c0_i32, %c0_i32_0 : i32, i32
  }
  func.func @transform_3(%arg0: i32, %arg1: i32) -> (i32, i32) {
    %c0_i32 = arith.constant 0 : i32
    %c0_i32_0 = arith.constant 0 : i32
    %c0_i32_1 = arith.constant 0 : i32
    return %c0_i32, %c0_i32_0 : i32, i32
  }
  func.func @transform_4(%arg0: i32, %arg1: i32) -> (i32, i32) {
    %c0_i32 = arith.constant 0 : i32
    %c0_i32_0 = arith.constant 0 : i32
    %c0_i32_1 = arith.constant 0 : i32
    return %c0_i32, %c0_i32_0 : i32, i32
  }
  func.func @transform_5(%arg0: i32, %arg1: i32) -> (i32, i32, i32, i32) {
    %c0_i32 = arith.constant 0 : i32
    %c0_i32_0 = arith.constant 0 : i32
    %c0_i32_1 = arith.constant 0 : i32
    return %arg0, %arg1, %c0_i32, %c0_i32_0 : i32, i32, i32, i32
  }
}

module attributes {stable_mosaic.version = 11 : i64} {
  func.func @bn_silu_conv3x3_kernel(%arg0: i32, %arg1: memref<1x16x16x16xf32, #tpu.memory_space<vmem>>, %arg2: memref<1x16xf32, #tpu.memory_space<vmem>>, %arg3: memref<1x16xf32, #tpu.memory_space<vmem>>, %arg4: memref<3x48x4xbf16, #tpu.memory_space<vmem>>, %arg5: memref<1x4xf32, #tpu.memory_space<vmem>>, %arg6: memref<1x16x16x4xf32, #tpu.memory_space<vmem>>) attributes {dimension_semantics = [#tpu.dimension_semantics<parallel>], iteration_bounds = array<i64: 2>, scalar_prefetch = 0 : i64, scratch_operands = 0 : i64, tpu.core_type = #tpu.core_type<tc>, window_params = [{transform_indices = @transform_0, window_bounds = array<i64: 1, 16, 16, 16>}, {pipeline_mode = #tpu.pipeline_mode<synchronous>, transform_indices = @transform_1, window_bounds = array<i64: 1, 16>}, {pipeline_mode = #tpu.pipeline_mode<synchronous>, transform_indices = @transform_2, window_bounds = array<i64: 1, 16>}, {pipeline_mode = #tpu.pipeline_mode<synchronous>, transform_indices = @transform_3, window_bounds = array<i64: 3, 48, 4>}, {pipeline_mode = #tpu.pipeline_mode<synchronous>, transform_indices = @transform_4, window_bounds = array<i64: 1, 4>}, {transform_indices = @transform_5, window_bounds = array<i64: 1, 16, 16, 4>}]} {
    %c0 = arith.constant 0 : index
    %c0_0 = arith.constant 0 : index
    %c0_1 = arith.constant 0 : index
    %c0_2 = arith.constant 0 : index
    %0 = vector.load %arg1[%c0, %c0_0, %c0_1, %c0_2] : memref<1x16x16x16xf32, #tpu.memory_space<vmem>>, vector<1x16x16x16xf32>
    %1 = vector.shape_cast %0 : vector<1x16x16x16xf32> to vector<16x16x16xf32>
    %c0_3 = arith.constant 0 : index
    %c0_4 = arith.constant 0 : index
    %2 = vector.load %arg2[%c0_3, %c0_4] : memref<1x16xf32, #tpu.memory_space<vmem>>, vector<1x16xf32>
    %3 = vector.shape_cast %2 : vector<1x16xf32> to vector<16xf32>
    %4 = vector.shape_cast %3 : vector<16xf32> to vector<1x1x16xf32>
    %5 = vector.broadcast %4 : vector<1x1x16xf32> to vector<16x16x16xf32>
    %6 = arith.mulf %1, %5 : vector<16x16x16xf32>
    %c0_5 = arith.constant 0 : index
    %c0_6 = arith.constant 0 : index
    %7 = vector.load %arg3[%c0_5, %c0_6] : memref<1x16xf32, #tpu.memory_space<vmem>>, vector<1x16xf32>
    %8 = vector.shape_cast %7 : vector<1x16xf32> to vector<16xf32>
    %9 = vector.shape_cast %8 : vector<16xf32> to vector<1x1x16xf32>
    %10 = vector.broadcast %9 : vector<1x1x16xf32> to vector<16x16x16xf32>
    %11 = arith.addf %6, %10 : vector<16x16x16xf32>
    %12 = arith.negf %11 : vector<16x16x16xf32>
    %13 = math.exp %12 : vector<16x16x16xf32>
    %cst = arith.constant 1.000000e+00 : f32
    %14 = vector.broadcast %cst : f32 to vector<16x16x16xf32>
    %15 = arith.addf %14, %13 : vector<16x16x16xf32>
    %16 = arith.divf %14, %15 : vector<16x16x16xf32>
    %17 = arith.mulf %11, %16 : vector<16x16x16xf32>
    %18 = arith.truncf %17 : vector<16x16x16xf32> to vector<16x16x16xbf16>
    %cst_7 = arith.constant 0.000000e+00 : bf16
    %19 = vector.broadcast %cst_7 : bf16 to vector<16x1x16xbf16>
    %20 = vector.extract_strided_slice %18 {offsets = [0, 0, 0], sizes = [16, 15, 16], strides = [1, 1, 1]} : vector<16x16x16xbf16> to vector<16x15x16xbf16>
    %21 = tpu.concatenate %19, %20 in 1 : vector<16x1x16xbf16>, vector<16x15x16xbf16> -> vector<16x16x16xbf16>
    %22 = vector.extract_strided_slice %18 {offsets = [0, 1, 0], sizes = [16, 15, 16], strides = [1, 1, 1]} : vector<16x16x16xbf16> to vector<16x15x16xbf16>
    %23 = tpu.concatenate %22, %19 in 1 : vector<16x15x16xbf16>, vector<16x1x16xbf16> -> vector<16x16x16xbf16>
    %24 = tpu.concatenate %21, %18, %23 in 2 : vector<16x16x16xbf16>, vector<16x16x16xbf16>, vector<16x16x16xbf16> -> vector<16x16x48xbf16>
    %cst_8 = arith.constant 0.000000e+00 : bf16
    %25 = vector.broadcast %cst_8 : bf16 to vector<1x16x48xbf16>
    %26 = vector.extract_strided_slice %24 {offsets = [0, 0, 0], sizes = [15, 16, 48], strides = [1, 1, 1]} : vector<16x16x48xbf16> to vector<15x16x48xbf16>
    %27 = tpu.concatenate %25, %26 in 0 : vector<1x16x48xbf16>, vector<15x16x48xbf16> -> vector<16x16x48xbf16>
    %28 = vector.extract_strided_slice %24 {offsets = [1, 0, 0], sizes = [15, 16, 48], strides = [1, 1, 1]} : vector<16x16x48xbf16> to vector<15x16x48xbf16>
    %29 = tpu.concatenate %28, %25 in 0 : vector<15x16x48xbf16>, vector<1x16x48xbf16> -> vector<16x16x48xbf16>
    %30 = vector.shape_cast %27 : vector<16x16x48xbf16> to vector<256x48xbf16>
    %c0_9 = arith.constant 0 : index
    %c0_10 = arith.constant 0 : index
    %c0_11 = arith.constant 0 : index
    %31 = vector.load %arg4[%c0_9, %c0_10, %c0_11] : memref<3x48x4xbf16, #tpu.memory_space<vmem>>, vector<1x48x4xbf16>
    %32 = vector.shape_cast %31 : vector<1x48x4xbf16> to vector<48x4xbf16>
    %cst_12 = arith.constant dense<0.000000e+00> : vector<256x4xf32>
    %33 = tpu.matmul %30, %32, %cst_12 {dimension_numbers = #tpu.dot_dimension_numbers<[1], [0], [0], [1], [0, 0, 1, 1], [], []>} : vector<256x48xbf16>, vector<48x4xbf16>, vector<256x4xf32> -> vector<256x4xf32>
    %34 = vector.shape_cast %24 : vector<16x16x48xbf16> to vector<256x48xbf16>
    %c1 = arith.constant 1 : index
    %c0_13 = arith.constant 0 : index
    %c0_14 = arith.constant 0 : index
    %35 = vector.load %arg4[%c1, %c0_13, %c0_14] : memref<3x48x4xbf16, #tpu.memory_space<vmem>>, vector<1x48x4xbf16>
    %36 = vector.shape_cast %35 : vector<1x48x4xbf16> to vector<48x4xbf16>
    %cst_15 = arith.constant dense<0.000000e+00> : vector<256x4xf32>
    %37 = tpu.matmul %34, %36, %cst_15 {dimension_numbers = #tpu.dot_dimension_numbers<[1], [0], [0], [1], [0, 0, 1, 1], [], []>} : vector<256x48xbf16>, vector<48x4xbf16>, vector<256x4xf32> -> vector<256x4xf32>
    %38 = arith.addf %33, %37 : vector<256x4xf32>
    %39 = vector.shape_cast %29 : vector<16x16x48xbf16> to vector<256x48xbf16>
    %c2 = arith.constant 2 : index
    %c0_16 = arith.constant 0 : index
    %c0_17 = arith.constant 0 : index
    %40 = vector.load %arg4[%c2, %c0_16, %c0_17] : memref<3x48x4xbf16, #tpu.memory_space<vmem>>, vector<1x48x4xbf16>
    %41 = vector.shape_cast %40 : vector<1x48x4xbf16> to vector<48x4xbf16>
    %cst_18 = arith.constant dense<0.000000e+00> : vector<256x4xf32>
    %42 = tpu.matmul %39, %41, %cst_18 {dimension_numbers = #tpu.dot_dimension_numbers<[1], [0], [0], [1], [0, 0, 1, 1], [], []>} : vector<256x48xbf16>, vector<48x4xbf16>, vector<256x4xf32> -> vector<256x4xf32>
    %43 = arith.addf %38, %42 : vector<256x4xf32>
    %c0_19 = arith.constant 0 : index
    %c0_20 = arith.constant 0 : index
    %44 = vector.load %arg5[%c0_19, %c0_20] : memref<1x4xf32, #tpu.memory_space<vmem>>, vector<1x4xf32>
    %45 = vector.broadcast %44 : vector<1x4xf32> to vector<256x4xf32>
    %46 = arith.addf %43, %45 : vector<256x4xf32>
    %47 = vector.shape_cast %46 : vector<256x4xf32> to vector<16x16x4xf32>
    %c0_21 = arith.constant 0 : index
    %c0_22 = arith.constant 0 : index
    %c0_23 = arith.constant 0 : index
    %c0_24 = arith.constant 0 : index
    %48 = vector.load %arg6[%c0_21, %c0_22, %c0_23, %c0_24] : memref<1x16x16x4xf32, #tpu.memory_space<vmem>>, vector<1x16x16x4xf32>
    %49 = vector.shape_cast %48 : vector<1x16x16x4xf32> to vector<16x16x4xf32>
    %50 = vector.shape_cast %47 : vector<16x16x4xf32> to vector<1x16x16x4xf32>
    tpu.vector_store %arg6[%c0_21, %c0_22, %c0_23, %c0_24], %50 {strides = array<i32>} : memref<1x16x16x4xf32, #tpu.memory_space<vmem>>, vector<1x16x16x4xf32>,
    return
  }
  func.func @transform_0(%arg0: i32) -> (i32, i32, i32, i32) {
    %c0_i32 = arith.constant 0 : i32
    %c0_i32_0 = arith.constant 0 : i32
    %c0_i32_1 = arith.constant 0 : i32
    %c0_i32_2 = arith.constant 0 : i32
    return %arg0, %c0_i32, %c0_i32_0, %c0_i32_1 : i32, i32, i32, i32
  }
  func.func @transform_1(%arg0: i32) -> (i32, i32) {
    %c0_i32 = arith.constant 0 : i32
    %c0_i32_0 = arith.constant 0 : i32
    %c0_i32_1 = arith.constant 0 : i32
    return %c0_i32, %c0_i32_0 : i32, i32
  }
  func.func @transform_2(%arg0: i32) -> (i32, i32) {
    %c0_i32 = arith.constant 0 : i32
    %c0_i32_0 = arith.constant 0 : i32
    %c0_i32_1 = arith.constant 0 : i32
    return %c0_i32, %c0_i32_0 : i32, i32
  }
  func.func @transform_3(%arg0: i32) -> (i32, i32, i32) {
    %c0_i32 = arith.constant 0 : i32
    %c0_i32_0 = arith.constant 0 : i32
    %c0_i32_1 = arith.constant 0 : i32
    %c0_i32_2 = arith.constant 0 : i32
    return %c0_i32, %c0_i32_0, %c0_i32_1 : i32, i32, i32
  }
  func.func @transform_4(%arg0: i32) -> (i32, i32) {
    %c0_i32 = arith.constant 0 : i32
    %c0_i32_0 = arith.constant 0 : i32
    %c0_i32_1 = arith.constant 0 : i32
    return %c0_i32, %c0_i32_0 : i32, i32
  }
  func.func @transform_5(%arg0: i32) -> (i32, i32, i32, i32) {
    %c0_i32 = arith.constant 0 : i32
    %c0_i32_0 = arith.constant 0 : i32
    %c0_i32_1 = arith.constant 0 : i32
    %c0_i32_2 = arith.constant 0 : i32
    return %arg0, %c0_i32, %c0_i32_0, %c0_i32_1 : i32, i32, i32, i32
  }
}

</mosaic_0001>

<bundles_post_ra>
// kernel: dense_layer_forward.2
= control target key start
LH: loop header
LB: loop body
LE: loop exit
PB: predicated region body
PF: predicated region fallthrough
CT: control target
= control target key end

     0   :  { %s949_s18 = smov 0   ;;  %s951_s19 = smov 0   ;;  %s1179_s0 = inlined_call_operand.vmem [shape: f32[2,16,16,4], index: 0, kind: input, shape index: {}]   ;;  %s1180_s1 = inlined_call_operand.vmem [shape: f32[1,4], index: 1, kind: input, shape index: {}]   ;;  %s1181_s2 = inlined_call_operand.vmem [shape: f32[1,4], index: 2, kind: input, shape index: {}]   ;;  %s1182_s3 = inlined_call_operand.vmem [shape: bf16[4,16], index: 3, kind: input, shape index: {}]   ;;  %s1183_s4 = inlined_call_operand.vmem [shape: f32[1,16], index: 4, kind: input, shape index: {}]   ;;  %s1184_s5 = inlined_call_operand.vmem [shape: f32[2,16,16,16], index: 5, kind: output, shape index: {}]  }
   0x1   :  { %s953_s20 = smov 0   ;;  %s955_s21 = smov 0  }
   0x2   :  { %s957_s22 = smov 0  }
   0x3 LB: > { %s24_s23 = sadd.s32 1, %s909_s20  ;;  %s27_s24 = sadd.s32 1, %s913_s21  ;;  %s917_s22 = sphi %s957_s22, %s15_s22   ;;  %s913_s21 = sphi %s955_s21, %s1188_s21   ;;  %s909_s20 = sphi %s953_s20, %s1187_s20   ;;  %s905_s19 = sphi %s951_s19, %s1186_s19   ;;  %s901_s18 = sphi %s949_s18, %s1185_s18  }
   0x4   : > { %p25_p0 = scmp.ge.s32.totalorder %s24_s23, 2  ;;  %p706_p1 = scmp.ge.s32.totalorder %s917_s22, 1 }
   0x5   : > { %p209_p2 = scmp.lt.s32.totalorder %s917_s22, 5 }
   0x6   : > { %s1190_s23 = smov (%p25_p0, %s24_s23), 0  ;;  %s1192_s24 = smov (!%p25_p0, %s27_s24), %s913_s21 }
   0x7   : > { %p210_p3 = pnand %p706_p1, %p209_p2  ;;  %p29_p4 = scmp.ge.s32.totalorder %s1192_s24, 2 }
   0x8   : > { %v452_v0 = vld [vmem:[%s1182_s3] sm:$0x3] (!%p210_p3)  ;;  %vm485_vm0 = vcmask (!%p210_p3), 1041408   ;;  %s707_s27 = sshll.u32 (!%p210_p3), %s901_s18, 3  ;;  %p248_p5 = scmp.lt.s32.totalorder (!%p210_p3), %s905_s19, 1  ;;  %vm460_vm1 = vcmask (!%p210_p3), 31744  }
   0x9   : > { %s1194_s24 = smov (%p29_p4, %s1192_s24), 0  ;;  %213 = sbr.rel (%p210_p3) target bundleno = 301 (0x12d), region = 40 }
   0xa   : > { %773 = vmatprep.subr.msk.bf16.mxu0 (!%p210_p3), %vm485_vm0, %v452_v0  ;;  %774 = vmatprep.subr.msk.bf16.mxu1 (!%p210_p3), %vm485_vm0, %v452_v0  ;;  %v487_v1 = vsel (!%p210_p3), %vm485_vm0, %v452_v0, 0  ;;  %p250_p6 = scmp.lt.s32.totalorder (!%p210_p3), %s707_s27, 15  ;;  %v988_v2 = vld [vmem:[%s1180_s1] ss:$0 sm:$0xff] (!%p210_p3)  ;;  %vm586_vm2 = vcmask (!%p210_p3), 130048  }
   0xb   : > { %754 = vmatpush3.bf16.msra.mxu0 (!%p210_p3), %v487_v1  ;;  %772 = vmatpush3.bf16.msra.mxu1 (!%p210_p3), %v487_v1  ;;  %v1000_v3 = vld [vmem:[%s1181_s2] ss:$0 sm:$0xff] (!%p210_p3) }
  0x10   : > { %s1196_s19 = smov (!%p248_p5, %s905_s19), 1  ;;  %s1198_s27 = smov (!%p250_p6, %s707_s27), 15 }
  0x11   : > { %s709_s28 = sshll.u32 %s1196_s19, 5  ;;  %s708_s29 = sshll.u32 %s1198_s27, 1 }
  0x12   : > { %s982_s30 = sadd.s32 %s709_s28, %s708_s29 }
  0x13   : > { %s710_s6 = sshll.u32 %s982_s30, 3 }
  0x14   : > { %s995_s11 = scalar_lea.vmem %s1179_s0, %s710_s6  ;;  %s1130_s18 = scalar_lea.vmem %s1184_s5, %s710_s6 }
  0x15   : > { %v270_v4 = vld [vmem:[%s995_s11] sm:$0xff]  ;;  %v271_v5 = vld [vmem:[%s995_s11 + $0x8] sm:$0xff]  ;;  %v272_v11 = vld [vmem:[%s995_s11 + $0x10] sm:$0xff] }
  0x16   : > { %v278_v6 = vld [vmem:[%s995_s11 + $0x40] sm:$0xff]  ;;  %v293_v7 = vmul.f32 %v988_v2, %v270_v4  ;;  %v294_v8 = vmul.f32 %v988_v2, %v271_v5  ;;  %v279_v9 = vld [vmem:[%s995_s11 + $0x48] sm:$0xff]  ;;  %v273_v12 = vld [vmem:[%s995_s11 + $0x18] sm:$0xff]  ;;  %v295_v14 = vmul.f32 %v988_v2, %v272_v11 }
  0x17   : > { %v301_v10 = vmul.f32 %v988_v2, %v278_v6  ;;  %v302_v13 = vmul.f32 %v988_v2, %v279_v9  ;;  %v296_v15 = vmul.f32 %v988_v2, %v273_v12  ;;  %v280_v16 = vld [vmem:[%s995_s11 + $0x50] sm:$0xff]  ;;  %v281_v17 = vld [vmem:[%s995_s11 + $0x58] sm:$0xff]  ;;  %v274_v22 = vld [vmem:[%s995_s11 + $0x20] sm:$0xff] }
  0x18   : > { %v1017_v18 = vadd.f32 %v1000_v3, %v293_v7  ;;  %v1020_v19 = vadd.f32 %v1000_v3, %v294_v8  ;;  %v303_v21 = vmul.f32 %v988_v2, %v280_v16  ;;  %v1031_v24 = vadd.f32 %v1000_v3, %v295_v14  ;;  %v275_v27 = vld [vmem:[%s995_s11 + $0x28] sm:$0xff]  ;;  %v282_v28 = vld [vmem:[%s995_s11 + $0x60] sm:$0xff]  ;;  %v276_v37 = vld [vmem:[%s995_s11 + $0x30] sm:$0xff] }
  0x19   : > { %v1023_v20 = vadd.f32 %v1000_v3, %v301_v10  ;;  %v1028_v23 = vadd.f32 %v1000_v3, %v302_v13  ;;  %v1034_v25 = vadd.f32 %v1000_v3, %v296_v15  ;;  %v304_v26 = vmul.f32 %v988_v2, %v281_v17  ;;  %v283_v29 = vld [vmem:[%s995_s11 + $0x68] sm:$0xff]  ;;  %v277_v57 = vld [vmem:[%s995_s11 + $0x38] sm:$0xff]  ;;  %v284_v62 = vld [vmem:[%s995_s11 + $0x70] sm:$0xff] }
  0x1a   : > { %v717_v30 = vmul.f32 -1.442695, %v1017_v18  ;;  %v718_v31 = vmul.f32 -1.442695, %v1020_v19  ;;  %v1044_v33 = vadd.f32 %v1000_v3, %v303_v21  ;;  %v719_v35 = vmul.f32 -1.442695, %v1031_v24 }
  0x1b   : > { %v725_v32 = vmul.f32 -1.442695, %v1023_v20  ;;  %v726_v34 = vmul.f32 -1.442695, %v1028_v23  ;;  %v1049_v36 = vadd.f32 %v1000_v3, %v304_v26  ;;  %v720_v38 = vmul.f32 -1.442695, %v1034_v25 }
  0x1c   : > { %815 = vpow2.f32 %v717_v30  ;;  %v297_v39 = vmul.f32 %v988_v2, %v274_v22  ;;  %v298_v40 = vmul.f32 %v988_v2, %v275_v27  ;;  %v727_v41 = vmul.f32 -1.442695, %v1044_v33  ;;  %v285_v4 = vld [vmem:[%s995_s11 + $0x78] sm:$0xff] }
  0x1d   : > { %817 = vpow2.f32 %v718_v31  ;;  %v305_v42 = vmul.f32 %v988_v2, %v282_v28  ;;  %v306_v43 = vmul.f32 %v988_v2, %v283_v29  ;;  %v299_v46 = vmul.f32 %v988_v2, %v276_v37 }
  0x1e   : > { %819 = vpow2.f32 %v725_v32  ;;  %v1059_v44 = vadd.f32 %v1000_v3, %v297_v39  ;;  %v1062_v45 = vadd.f32 %v1000_v3, %v298_v40  ;;  %v728_v47 = vmul.f32 -1.442695, %v1049_v36 }
  0x1f   : > { %821 = vpow2.f32 %v726_v34  ;;  %v1067_v48 = vadd.f32 %v1000_v3, %v305_v42  ;;  %v1070_v49 = vadd.f32 %v1000_v3, %v306_v43  ;;  %v1074_v51 = vadd.f32 %v1000_v3, %v299_v46 }
  0x20   : > { %823 = vpow2.f32 %v719_v35  ;;  %v721_v50 = vmul.f32 -1.442695, %v1059_v44  ;;  %v722_v52 = vmul.f32 -1.442695, %v1062_v45  ;;  %v300_v1 = vmul.f32 %v988_v2, %v277_v57 }
  0x21   : > { %825 = vpow2.f32 %v720_v38  ;;  %v729_v53 = vmul.f32 -1.442695, %v1067_v48  ;;  %v730_v54 = vmul.f32 -1.442695, %v1070_v49  ;;  %v723_v55 = vmul.f32 -1.442695, %v1074_v51 }
  0x22   : > { %827 = vpow2.f32 %v727_v41  ;;  %v307_v9 = vmul.f32 %v988_v2, %v284_v62  ;;  %v308_v12 = vmul.f32 %v988_v2, %v285_v4  ;;  %v1087_v15 = vadd.f32 %v1000_v3, %v300_v1 }
  0x23   : > { %829 = vpow2.f32 %v728_v47 }
  0x24   : > { %831 = vpow2.f32 %v721_v50  ;;  %v1090_v26 = vadd.f32 %v1000_v3, %v307_v9  ;;  %v1093_v2 = vadd.f32 %v1000_v3, %v308_v12  ;;  %v724_v31 = vmul.f32 -1.442695, %v1087_v15 }
  0x25   : > { %833 = vpow2.f32 %v722_v52 }
  0x26   : > { %v816_v56 = vpop.eup %815  ;;  %835 = vpow2.f32 %v729_v53  ;;  %v731_v37 = vmul.f32 -1.442695, %v1090_v26  ;;  %v732_v40 = vmul.f32 -1.442695, %v1093_v2 }
  0x27   : > { %v818_v58 = vpop.eup %817  ;;  %v380_v59 = vadd.f32 1.0, %v816_v56  ;;  %837 = vpow2.f32 %v730_v54 }
  0x28   : > { %v820_v60 = vpop.eup %819  ;;  %v381_v61 = vadd.f32 1.0, %v818_v58  ;;  %839 = vpow2.f32 %v723_v55 }
  0x29   : > { %v822_v63 = vpop.eup %821  ;;  %841 = vrcp.f32 %v380_v59  ;;  %v388_v0 = vadd.f32 1.0, %v820_v60 }
  0x2a   : > { %v824_v5 = vpop.eup %823  ;;  %843 = vrcp.f32 %v381_v61  ;;  %v389_v6 = vadd.f32 1.0, %v822_v63 }
  0x2b   : > { %v826_v7 = vpop.eup %825  ;;  %845 = vrcp.f32 %v388_v0  ;;  %v382_v8 = vadd.f32 1.0, %v824_v5 }
  0x2c   : > { %v828_v10 = vpop.eup %827  ;;  %847 = vrcp.f32 %v389_v6  ;;  %v383_v11 = vadd.f32 1.0, %v826_v7 }
  0x2d   : > { %v830_v13 = vpop.eup %829  ;;  %849 = vrcp.f32 %v382_v8  ;;  %v390_v14 = vadd.f32 1.0, %v828_v10 }
  0x2e   : > { %v832_v16 = vpop.eup %831  ;;  %851 = vrcp.f32 %v383_v11  ;;  %v391_v17 = vadd.f32 1.0, %v830_v13 }
  0x2f   : > { %v834_v21 = vpop.eup %833  ;;  %853 = vrcp.f32 %v390_v14  ;;  %v384_v22 = vadd.f32 1.0, %v832_v16  ;;  %v733_v16 = vld [vmem:[%s1183_s4] ss:$0 sm:$0xff] }
  0x30   : > { %v836_v27 = vpop.eup %835  ;;  %855 = vrcp.f32 %v391_v17  ;;  %v385_v28 = vadd.f32 1.0, %v834_v21 }
  0x31   : > { %v838_v29 = vpop.eup %837  ;;  %857 = vrcp.f32 %v384_v22  ;;  %v392_v30 = vadd.f32 1.0, %v836_v27 }
  0x32   : > { %v840_v32 = vpop.eup %839  ;;  %859 = vrcp.f32 %v385_v28  ;;  %v393_v34 = vadd.f32 1.0, %v838_v29 }
  0x33   : > { %v842_v35 = vpop.eup %841  ;;  %861 = vrcp.f32 %v392_v30  ;;  %v386_v57 = vadd.f32 1.0, %v840_v32 }
  0x34   : > { %v844_v38 = vpop.eup %843  ;;  %v428_v39 = vmul.f32 %v842_v35, %v1017_v18  ;;  %863 = vrcp.f32 %v393_v34 }
  0x35   : > { %v846_v3 = vpop.eup %845  ;;  %v429_v41 = vmul.f32 %v844_v38, %v1020_v19  ;;  %865 = vpow2.f32 %v724_v31 }
  0x36   : > { %v848_v42 = vpop.eup %847  ;;  %v436_v43 = vmul.f32 %v846_v3, %v1023_v20  ;;  %867 = vpow2.f32 %v731_v37 }
  0x37   : > { %v850_v46 = vpop.eup %849  ;;  %v444_v47 = vpack.c.bf16 %v429_v41, %v428_v39  ;;  %v437_v50 = vmul.f32 %v848_v42, %v1028_v23  ;;  %869 = vpow2.f32 %v732_v40 }
  0x38   : > { %v852_v52 = vpop.eup %851  ;;  %v430_v53 = vmul.f32 %v850_v46, %v1031_v24  ;;  %871 = vrcp.f32 %v386_v57 }
  0x39   : > { %v854_v18 = vpop.eup %853  ;;  %755 = vmatprep.mubr.msk.bf16.mxu0 %vm460_vm1, %v444_v47  ;;  %v448_v54 = vpack.c.bf16 %v437_v50, %v436_v43  ;;  %v431_v19 = vmul.f32 %v852_v52, %v1034_v25 }
  0x3a   : > { %v856_v55 = vpop.eup %855  ;;  %v438_v56 = vmul.f32 %v854_v18, %v1044_v33 }
  0x3b   : > { %v858_v20 = vpop.eup %857  ;;  %763 = vmatprep.mubr.msk.bf16.mxu1 %vm460_vm1, %v448_v54  ;;  %v445_v58 = vpack.c.bf16 %v431_v19, %v430_v53  ;;  %v439_v23 = vmul.f32 %v856_v55, %v1049_v36 }
  0x3c   : > { %v860_v59 = vpop.eup %859  ;;  %v432_v24 = vmul.f32 %v858_v20, %v1059_v44 }
  0x3d   : > { %v862_v60 = vpop.eup %861  ;;  %756 = vmatmul.mubr.msk.bf16.vlgmr.msra.gmra.mrb[0].mxu0 %vm460_vm1, %v445_v58  ;;  %v449_v61 = vpack.c.bf16 %v439_v23, %v438_v56  ;;  %v433_v62 = vmul.f32 %v860_v59, %v1062_v45 }
  0x3e   : > { %v864_v25 = vpop.eup %863  ;;  %v440_v63 = vmul.f32 %v862_v60, %v1067_v48 }
  0x3f   : > { %v866_v33 = vpop.eup %865  ;;  %764 = vmatmul.mubr.msk.bf16.vlgmr.msra.gmra.mrb[0].mxu1 %vm460_vm1, %v449_v61  ;;  %v446_v0 = vpack.c.bf16 %v433_v62, %v432_v24  ;;  %v441_v1 = vmul.f32 %v864_v25, %v1070_v49 }
  0x40   : > { %v387_v36 = vadd.f32 1.0, %v866_v33  ;;  %v868_v4 = vpop.eup %867 }
  0x41   : > { %759 = vmatprep.mubr.msk.bf16.mxu0 %vm460_vm1, %v446_v0  ;;  %v450_v44 = vpack.c.bf16 %v441_v1, %v440_v63  ;;  %v870_v5 = vpop.eup %869  ;;  %v394_v6 = vadd.f32 1.0, %v868_v4 }
  0x42   : > { %873 = vrcp.f32 %v387_v36  ;;  %v395_v45 = vadd.f32 1.0, %v870_v5  ;;  %v872_v48 = vpop.eup %871 }
  0x43   : > { %767 = vmatprep.mubr.msk.bf16.mxu1 %vm460_vm1, %v450_v44  ;;  %875 = vrcp.f32 %v394_v6  ;;  %v434_v7 = vmul.f32 %v872_v48, %v1074_v51 }
  0x44   : > { %877 = vrcp.f32 %v395_v45 }
  0x4c   : > { %v874_v8 = vpop.eup %873 }
  0x4d   : > { %v435_v49 = vmul.f32 %v874_v8, %v1087_v15  ;;  %v876_v9 = vpop.eup %875 }
  0x4e   : > { %v878_v10 = vpop.eup %877  ;;  %v442_v12 = vmul.f32 %v876_v9, %v1090_v26 }
  0x4f   : > { %v447_v11 = vpack.c.bf16 %v435_v49, %v434_v7  ;;  %v443_v13 = vmul.f32 %v878_v10, %v1093_v2 }
  0x51   : > { %760 = vmatmul.mubr.msk.bf16.gmra.mrb[4].mxu0 %vm460_vm1, %v447_v11  ;;  %v451_v14 = vpack.c.bf16 %v443_v13, %v442_v12 }
  0x53   : > { %768 = vmatmul.mubr.msk.bf16.gmra.mrb[4].mxu1 %vm460_vm1, %v451_v14 }
 0x110   : > { %v757_v51 = vpop.f32.mrb[0].mxu0 }
 0x111   : > { %v532_v15 = vadd.f32 %v757_v51, %v733_v16  ;;  %v523_v17 = vpop.f32.mrb[1].mxu0 }
 0x112   : > { %v765_v21 = vpop.f32.mrb[0].mxu1  ;;  %v524_v22 = vadd.f32 %v733_v16, %v523_v17  ;;  %v758_v26 = vpop.f32.mrb[2].mxu0 }
 0x113   : > { %589 = vst.msk [vmem:[%s1130_s18 + $0x10] sm:$0xff] %vm586_vm2, %v532_v15  ;;  %v564_v27 = vadd.f32 %v765_v21, %v733_v16  ;;  %v555_v28 = vpop.f32.mrb[1].mxu1  ;;  %v535_v2 = vadd.f32 %v758_v26, %v733_v16  ;;  %v526_v29 = vpop.f32.mrb[3].mxu0 }
 0x114   : > { %587 = vst.msk [vmem:[%s1130_s18] sm:$0xff] %vm586_vm2, %v524_v22  ;;  %v556_v30 = vadd.f32 %v733_v16, %v555_v28  ;;  %v766_v31 = vpop.f32.mrb[2].mxu1  ;;  %v527_v32 = vadd.f32 %v733_v16, %v526_v29 }
 0x115   : > { %597 = vst.msk [vmem:[%s1130_s18 + $0x50] sm:$0xff] %vm586_vm2, %v564_v27  ;;  %590 = vst.msk [vmem:[%s1130_s18 + $0x18] sm:$0xff] %vm586_vm2, %v535_v2  ;;  %v567_v34 = vadd.f32 %v766_v31, %v733_v16  ;;  %v558_v35 = vpop.f32.mrb[3].mxu1 }
 0x116   : > { %595 = vst.msk [vmem:[%s1130_s18 + $0x40] sm:$0xff] %vm586_vm2, %v556_v30  ;;  %588 = vst.msk [vmem:[%s1130_s18 + $0x8] sm:$0xff] %vm586_vm2, %v527_v32  ;;  %v559_v37 = vadd.f32 %v733_v16, %v558_v35 }
 0x117   : > { %598 = vst.msk [vmem:[%s1130_s18 + $0x58] sm:$0xff] %vm586_vm2, %v567_v34 }
 0x118   : > { %596 = vst.msk [vmem:[%s1130_s18 + $0x48] sm:$0xff] %vm586_vm2, %v559_v37 }
 0x124   : > { %v761_v38 = vpop.f32.mrb[4].mxu0 }
 0x125   : > { %v548_v39 = vadd.f32 %v761_v38, %v733_v16  ;;  %v539_v40 = vpop.f32.mrb[5].mxu0 }
 0x126   : > { %v540_v3 = vadd.f32 %v733_v16, %v539_v40  ;;  %v762_v41 = vpop.f32.mrb[6].mxu0  ;;  %v769_v42 = vpop.f32.mrb[4].mxu1 }
 0x127   : > { %593 = vst.msk [vmem:[%s1130_s18 + $0x30] sm:$0xff] %vm586_vm2, %v548_v39  ;;  %v551_v43 = vadd.f32 %v762_v41, %v733_v16  ;;  %v542_v46 = vpop.f32.mrb[7].mxu0  ;;  %v580_v47 = vadd.f32 %v769_v42, %v733_v16  ;;  %v571_v50 = vpop.f32.mrb[5].mxu1 }
 0x128   : > { %591 = vst.msk [vmem:[%s1130_s18 + $0x20] sm:$0xff] %vm586_vm2, %v540_v3  ;;  %v543_v52 = vadd.f32 %v733_v16, %v542_v46  ;;  %v572_v53 = vadd.f32 %v733_v16, %v571_v50  ;;  %v770_v18 = vpop.f32.mrb[6].mxu1 }
 0x129   : > { %594 = vst.msk [vmem:[%s1130_s18 + $0x38] sm:$0xff] %vm586_vm2, %v551_v43  ;;  %601 = vst.msk [vmem:[%s1130_s18 + $0x70] sm:$0xff] %vm586_vm2, %v580_v47  ;;  %v583_v54 = vadd.f32 %v770_v18, %v733_v16  ;;  %v574_v19 = vpop.f32.mrb[7].mxu1 }
 0x12a   : > { %592 = vst.msk [vmem:[%s1130_s18 + $0x28] sm:$0xff] %vm586_vm2, %v543_v52  ;;  %599 = vst.msk [vmem:[%s1130_s18 + $0x60] sm:$0xff] %vm586_vm2, %v572_v53  ;;  %v575_v55 = vadd.f32 %v733_v16, %v574_v19 }
 0x12b   : > { %602 = vst.msk [vmem:[%s1130_s18 + $0x78] sm:$0xff] %vm586_vm2, %v583_v54 }
 0x12c   : > { %600 = vst.msk [vmem:[%s1130_s18 + $0x68] sm:$0xff] %vm586_vm2, %v575_v55 }
 0x12d PF: > { %s15_s22 = sadd.s32 1, %s917_s22   ;;  %s1185_s18 = smov %s909_s20 }
 0x12e   : > { %p12_p7 = scmp.ge.s32.totalorder %s15_s22, 6   ;;  %s1186_s19 = smov %s913_s21 }
 0x12f   : > { %s1187_s20 = smov %s1190_s23  ;;  %s1188_s21 = smov %s1194_s24 }
 0x130   :  { %14 = sbr.rel (!%p12_p7) target bundleno = 3 (0x3), region = 70 }

// kernel: dense_layer_forward.3
= control target key start
LH: loop header
LB: loop body
LE: loop exit
PB: predicated region body
PF: predicated region fallthrough
CT: control target
= control target key end

     0   :  { %s2267_s18 = smov 0   ;;  %s2998_s0 = inlined_call_operand.vmem [shape: f32[2,16,16,16], index: 0, kind: input, shape index: {}]   ;;  %s2999_s1 = inlined_call_operand.vmem [shape: f32[1,16], index: 1, kind: input, shape index: {}]   ;;  %s3000_s2 = inlined_call_operand.vmem [shape: f32[1,16], index: 2, kind: input, shape index: {}]   ;;  %s3001_s3 = inlined_call_operand.vmem [shape: bf16[3,48,4], index: 3, kind: input, shape index: {}]   ;;  %s3002_s4 = inlined_call_operand.vmem [shape: f32[1,4], index: 4, kind: input, shape index: {}]   ;;  %s3003_s5 = inlined_call_operand.vmem [shape: f32[2,16,16,4], index: 5, kind: output, shape index: {}]  }
   0x1 LB: > { %s1720_s19 = sadd.s32 4294967295, %s2232_s18   ;;  %p1724_p0 = scmp.ge.s32.totalorder %s2232_s18, 1  ;;  %s2232_s18 = sphi %s2267_s18, %s15_s18  }
   0x2   : > { %p187_p1 = scmp.lt.s32.totalorder %s2232_s18, 3 }
   0x4   : > { %p188_p2 = pnand %p1724_p0, %p187_p1 }
   0x5   : > { %p215_p3 = scmp.lt.s32.totalorder (!%p188_p2), %s1720_s19, 1  ;;  %v2280_v0 = vld [vmem:[%s2999_s1] ss:$0 sm:$0xff] (!%p188_p2)  ;;  %v2088_v2 = vld [vmem:[%s3001_s3 + $0x18] sm:$0xff] (!%p188_p2)   ;;  %v2089_v3 = vld [vmem:[%s3001_s3 + $0x8] sm:$0xff] (!%p188_p2)   ;;  %vm771_vm0 = vcmask (!%p188_p2), 1047552  }
   0x6   : > { %191 = sbr.rel (%p188_p2) target bundleno = 500 (0x1f4), region = 40  ;;  %v2285_v1 = vld [vmem:[%s3001_s3] sm:$0xff] (!%p188_p2)   ;;  %1892 = vmatprep.subr.bf16.mxu1 (!%p188_p2), %v2088_v2  ;;  %vm772_vm1 = vsmask.f32 (!%p188_p2), 7424  ;;  %s2234_s17 = smov (!%p188_p2), 16   ;;  %vm704_vm3 = vcmask (!%p188_p2), 1040384  }
   0x7   : > { %1930 = vmatprep.subr.bf16.mxu0 (!%p188_p2), %v2285_v1  ;;  %v2305_v4 = vld [vmem:[%s3000_s2] ss:$0 sm:$0xff] (!%p188_p2)  ;;  %1893 = vmatpush3.bf16.msra.mxu1 (!%p188_p2), %v2088_v2  ;;  %vm2540_vm2 = vmand (!%p188_p2), %vm771_vm0, %vm772_vm1  ;;  %s2235_s20 = smov (!%p188_p2), 32   ;;  %vm705_vm4 = vsmask.f32 (!%p188_p2), 256  ;;  %vm886_vm6 = vcmask (!%p188_p2), 130048  }
   0x8   : > { %1931 = vmatpush3.bf16.msra.mxu0 (!%p188_p2), %v2285_v1  ;;  %vm2725_vm5 = vmand (!%p188_p2), %vm704_vm3, %vm705_vm4  ;;  %vm935_vm7 = vcmask (!%p188_p2), 261120   ;;  %vm999_vm8 = vcmask (!%p188_p2), 392192   ;;  %vm1632_vm9 = vcmask (!%p188_p2), 31744  }
   0x9   : > { %1932 = vmatprep.subr.bf16.mxu0 (!%p188_p2), %v2089_v3 }
   0xc   : > { %1933 = vmatpush3.bf16.msra.mxu0 (!%p188_p2), %v2089_v3 }
   0xd   : > { %s3009_s19 = smov (!%p215_p3, %s1720_s19), 1 }
   0xe   : > { %s1833_s26 = sshll.u32 %s3009_s19, 8 }
   0xf   : > { %s2300_s6 = scalar_lea.vmem %s2998_s0, %s1833_s26  ;;  %s2897_s9 = scalar_lea.vmem %s3003_s5, %s1833_s26 }
  0x10   : > { %v226_v5 = vld [vmem:[%s2300_s6] sm:$0xff]  ;;  %v227_v6 = vld [vmem:[%s2300_s6 + $0x8] sm:$0xff]  ;;  %v228_v7 = vld [vmem:[%s2300_s6 + $0x10] sm:$0xff] }
  0x11   : > { %v265_v8 = vmul.f32 %v2280_v0, %v226_v5  ;;  %v266_v9 = vmul.f32 %v2280_v0, %v227_v6  ;;  %v229_v10 = vld [vmem:[%s2300_s6 + $0x18] sm:$0xff]  ;;  %v267_v11 = vmul.f32 %v2280_v0, %v228_v7  ;;  %v230_v12 = vld [vmem:[%s2300_s6 + $0x20] sm:$0xff]  ;;  %v231_v13 = vld [vmem:[%s2300_s6 + $0x28] sm:$0xff] }
  0x12   : > { %v268_v14 = vmul.f32 %v2280_v0, %v229_v10  ;;  %v269_v15 = vmul.f32 %v2280_v0, %v230_v12  ;;  %v270_v16 = vmul.f32 %v2280_v0, %v231_v13  ;;  %v232_v17 = vld [vmem:[%s2300_s6 + $0x30] sm:$0xff]  ;;  %v233_v18 = vld [vmem:[%s2300_s6 + $0x38] sm:$0xff]  ;;  %v234_v23 = vld [vmem:[%s2300_s6 + $0x40] sm:$0xff] }
  0x13   : > { %v2323_v19 = vadd.f32 %v2305_v4, %v265_v8  ;;  %v2326_v20 = vadd.f32 %v2305_v4, %v266_v9  ;;  %v2329_v21 = vadd.f32 %v2305_v4, %v267_v11  ;;  %v271_v22 = vmul.f32 %v2280_v0, %v232_v17  ;;  %v235_v24 = vld [vmem:[%s2300_s6 + $0x48] sm:$0xff]  ;;  %v236_v29 = vld [vmem:[%s2300_s6 + $0x50] sm:$0xff]  ;;  %v237_v30 = vld [vmem:[%s2300_s6 + $0x58] sm:$0xff] }
  0x14   : > { %v2335_v25 = vadd.f32 %v2305_v4, %v268_v14  ;;  %v2338_v26 = vadd.f32 %v2305_v4, %v269_v15  ;;  %v2341_v27 = vadd.f32 %v2305_v4, %v270_v16  ;;  %v272_v28 = vmul.f32 %v2280_v0, %v233_v18  ;;  %v238_v31 = vld [vmem:[%s2300_s6 + $0x60] sm:$0xff]  ;;  %v239_v43 = vld [vmem:[%s2300_s6 + $0x68] sm:$0xff]  ;;  %v240_v56 = vld [vmem:[%s2300_s6 + $0x70] sm:$0xff] }
  0x15   : > { %v1731_v32 = vmul.f32 -1.442695, %v2323_v19  ;;  %v1732_v33 = vmul.f32 -1.442695, %v2326_v20  ;;  %v1733_v34 = vmul.f32 -1.442695, %v2329_v21  ;;  %v2351_v35 = vadd.f32 %v2305_v4, %v271_v22 }
  0x16   : > { %v1734_v36 = vmul.f32 -1.442695, %v2335_v25  ;;  %v1735_v37 = vmul.f32 -1.442695, %v2338_v26  ;;  %v1736_v38 = vmul.f32 -1.442695, %v2341_v27  ;;  %v2357_v39 = vadd.f32 %v2305_v4, %v272_v28 }
  0x17   : > { %2096 = vpow2.f32 %v1731_v32  ;;  %v1737_v40 = vmul.f32 -1.442695, %v2351_v35  ;;  %v273_v41 = vmul.f32 %v2280_v0, %v234_v23  ;;  %v274_v42 = vmul.f32 %v2280_v0, %v235_v24  ;;  %v241_v57 = vld [vmem:[%s2300_s6 + $0x78] sm:$0xff]  ;;  %v242_v62 = vld [vmem:[%s2300_s6 + $0x80] sm:$0xff]  ;;  %v243_v63 = vld [vmem:[%s2300_s6 + $0x88] sm:$0xff] }
  0x18   : > { %2098 = vpow2.f32 %v1732_v33  ;;  %v1738_v44 = vmul.f32 -1.442695, %v2357_v39  ;;  %v275_v45 = vmul.f32 %v2280_v0, %v236_v29  ;;  %v276_v46 = vmul.f32 %v2280_v0, %v237_v30  ;;  %v244_v9 = vld [vmem:[%s2300_s6 + $0x90] sm:$0xff]  ;;  %v245_v10 = vld [vmem:[%s2300_s6 + $0x98] sm:$0xff]  ;;  %v246_v15 = vld [vmem:[%s2300_s6 + $0xa0] sm:$0xff] }
  0x19   : > { %2100 = vpow2.f32 %v1733_v34  ;;  %v2367_v47 = vadd.f32 %v2305_v4, %v273_v41  ;;  %v2370_v48 = vadd.f32 %v2305_v4, %v274_v42  ;;  %v277_v49 = vmul.f32 %v2280_v0, %v238_v31  ;;  %v247_v16 = vld [vmem:[%s2300_s6 + $0xa8] sm:$0xff]  ;;  %v248_v24 = vld [vmem:[%s2300_s6 + $0xb0] sm:$0xff]  ;;  %v2090_v42 = vld [vmem:[%s3001_s3 + $0x20] sm:$0xff]  }
  0x1a   : > { %2102 = vpow2.f32 %v1734_v36  ;;  %v2374_v50 = vadd.f32 %v2305_v4, %v275_v45  ;;  %v2377_v51 = vadd.f32 %v2305_v4, %v276_v46  ;;  %v278_v52 = vmul.f32 %v2280_v0, %v239_v43  ;;  %v2427_v43 = vld [vmem:[%s3001_s3 + $0x10] sm:$0xff]   ;;  %1894 = vmatprep.subr.bf16.mxu1 %v2090_v42 }
  0x1b   : > { %2104 = vpow2.f32 %v1735_v37  ;;  %v1739_v53 = vmul.f32 -1.442695, %v2367_v47  ;;  %v2382_v54 = vadd.f32 %v2305_v4, %v277_v49  ;;  %v1740_v55 = vmul.f32 -1.442695, %v2370_v48  ;;  %1934 = vmatprep.subr.bf16.mxu0 %v2427_v43  ;;  %1895 = vmatpush3.bf16.msra.mxu1 %v2090_v42 }
  0x1c   : > { %2106 = vpow2.f32 %v1736_v38  ;;  %v1741_v58 = vmul.f32 -1.442695, %v2374_v50  ;;  %v1742_v59 = vmul.f32 -1.442695, %v2377_v51  ;;  %v2390_v60 = vadd.f32 %v2305_v4, %v278_v52  ;;  %v249_v52 = vld [vmem:[%s2300_s6 + $0xb8] sm:$0xff]  ;;  %1935 = vmatpush3.bf16.msra.mxu0 %v2427_v43 }
  0x1d   : > { %2108 = vpow2.f32 %v1737_v40  ;;  %v1743_v61 = vmul.f32 -1.442695, %v2382_v54  ;;  %v279_v2 = vmul.f32 %v2280_v0, %v240_v56  ;;  %v280_v3 = vmul.f32 %v2280_v0, %v241_v57 }
  0x1e   : > { %2110 = vpow2.f32 %v1738_v44  ;;  %v2398_v8 = vmul.f32 -1.442695, %v2390_v60  ;;  %v281_v13 = vmul.f32 %v2280_v0, %v242_v62  ;;  %v282_v14 = vmul.f32 %v2280_v0, %v243_v63 }
  0x1f   : > { %2112 = vpow2.f32 %v1739_v53  ;;  %v2407_v22 = vadd.f32 %v2305_v4, %v279_v2  ;;  %v2410_v23 = vadd.f32 %v2305_v4, %v280_v3  ;;  %v283_v30 = vmul.f32 %v2280_v0, %v244_v9 }
  0x20   : > { %2114 = vpow2.f32 %v1740_v55  ;;  %v284_v31 = vmul.f32 %v2280_v0, %v245_v10  ;;  %v285_v34 = vmul.f32 %v2280_v0, %v246_v15  ;;  %v286_v36 = vmul.f32 %v2280_v0, %v247_v16 }
  0x21   : > { %v2097_v5 = vpop.eup %2096  ;;  %2116 = vpow2.f32 %v1741_v58  ;;  %v2418_v40 = vadd.f32 %v2305_v4, %v281_v13  ;;  %v287_v41 = vmul.f32 %v2280_v0, %v248_v24  ;;  %v2430_v46 = vmul.f32 -1.442695, %v2407_v22  ;;  %v250_v13 = vld [vmem:[%s2300_s6 + $0xc0] sm:$0xff]  ;;  %v2092_v24 = vld [vmem:[%s3001_s3 + $0x28] sm:$0xff]  }
  0x22   : > { %v2099_v6 = vpop.eup %2098  ;;  %v432_v7 = vadd.f32 1.0, %v2097_v5  ;;  %2118 = vpow2.f32 %v1742_v59  ;;  %v2433_v49 = vadd.f32 %v2305_v4, %v282_v14  ;;  %v2437_v56 = vadd.f32 %v2305_v4, %v283_v30  ;;  %v256_v14 = vld [vmem:[%s2300_s6 + $0xf0] sm:$0xff]  ;;  %1896 = vmatprep.subr.bf16.mxu1 %v2092_v24 }
  0x23   : > { %v2101_v11 = vpop.eup %2100  ;;  %v433_v12 = vadd.f32 1.0, %v2099_v6  ;;  %2120 = vpow2.f32 %v1743_v61  ;;  %v2440_v57 = vadd.f32 %v2305_v4, %v284_v31  ;;  %v2444_v61 = vadd.f32 %v2305_v4, %v285_v34  ;;  %v254_v6 = vld [vmem:[%s2300_s6 + $0xe0] sm:$0xff]  ;;  %1897 = vmatpush3.bf16.msra.mxu1 %v2092_v24 }
  0x24   : > { %v2103_v17 = vpop.eup %2102  ;;  %2122 = vrcp.f32 %v432_v7  ;;  %v434_v18 = vadd.f32 1.0, %v2101_v11  ;;  %v2447_v62 = vadd.f32 %v2305_v4, %v286_v36  ;;  %v288_v3 = vmul.f32 %v2280_v0, %v249_v52  ;;  %v255_v7 = vld [vmem:[%s2300_s6 + $0xe8] sm:$0xff]  ;;  %2006 = vmatprep.subr.bf16.mxu1 %v2285_v1  ;;  %v252_v1 = vld [vmem:[%s2300_s6 + $0xd0] sm:$0xff] }
  0x25   : > { %v2105_v28 = vpop.eup %2104  ;;  %2124 = vrcp.f32 %v433_v12  ;;  %v435_v29 = vadd.f32 1.0, %v2103_v17  ;;  %v2452_v5 = vadd.f32 %v2305_v4, %v287_v41  ;;  %v1746_v11 = vmul.f32 -1.442695, %v2410_v23 }
  0x26   : > { %v2107_v32 = vpop.eup %2106  ;;  %2126 = vrcp.f32 %v434_v18  ;;  %v436_v33 = vadd.f32 1.0, %v2105_v28  ;;  %v1747_v12 = vmul.f32 -1.442695, %v2418_v40  ;;  %v2461_v17 = vmul.f32 -1.442695, %v2433_v49 }
  0x27   : > { %v2109_v37 = vpop.eup %2108  ;;  %2128 = vrcp.f32 %v435_v29  ;;  %v437_v38 = vadd.f32 1.0, %v2107_v32  ;;  %v2464_v18 = vmul.f32 -1.442695, %v2437_v56  ;;  %v2470_v29 = vmul.f32 -1.442695, %v2440_v57 }
  0x28   : > { %v2111_v44 = vpop.eup %2110  ;;  %2130 = vrcp.f32 %v436_v33  ;;  %v438_v45 = vadd.f32 1.0, %v2109_v37  ;;  %v2473_v30 = vmul.f32 -1.442695, %v2444_v61  ;;  %v2476_v31 = vmul.f32 -1.442695, %v2447_v62 }
  0x29   : > { %v2113_v53 = vpop.eup %2112  ;;  %2132 = vrcp.f32 %v437_v38  ;;  %v439_v55 = vadd.f32 1.0, %v2111_v44  ;;  %v2480_v34 = vadd.f32 %v2305_v4, %v288_v3  ;;  %v2483_v36 = vmul.f32 -1.442695, %v2452_v5  ;;  %v257_v44 = vld [vmem:[%s2300_s6 + $0xf8] sm:$0xff] }
  0x2a   : > { %v2115_v58 = vpop.eup %2114  ;;  %2134 = vrcp.f32 %v438_v45  ;;  %v440_v59 = vadd.f32 1.0, %v2113_v53  ;;  %v293_v41 = vmul.f32 %v2280_v0, %v254_v6  ;;  %v294_v42 = vmul.f32 %v2280_v0, %v255_v7 }
  0x2b   : > { %v2117_v63 = vpop.eup %2116  ;;  %2136 = vrcp.f32 %v439_v55  ;;  %v441_v2 = vadd.f32 1.0, %v2115_v58  ;;  %v289_v53 = vmul.f32 %v2280_v0, %v250_v13  ;;  %v2493_v55 = vmul.f32 %v2280_v0, %v256_v14 }
  0x2c   : > { %v2119_v9 = vpop.eup %2118  ;;  %2138 = vrcp.f32 %v440_v59  ;;  %v442_v10 = vadd.f32 1.0, %v2117_v63  ;;  %v251_v59 = vld [vmem:[%s2300_s6 + $0xc8] sm:$0xff]  ;;  %v2502_v63 = vadd.f32 %v2305_v4, %v293_v41  ;;  %v2512_v6 = vadd.f32 %v2305_v4, %v294_v42 }
  0x2d   : > { %v2121_v15 = vpop.eup %2120  ;;  %2140 = vrcp.f32 %v441_v2  ;;  %v443_v16 = vadd.f32 1.0, %v2119_v9  ;;  %v2527_v14 = vmul.f32 -1.442695, %v2480_v34 }
  0x2e   : > { %v2123_v28 = vpop.eup %2122  ;;  %2142 = vrcp.f32 %v442_v10  ;;  %v444_v52 = vadd.f32 1.0, %v2121_v15  ;;  %v290_v15 = vmul.f32 %v2280_v0, %v251_v59 }
  0x2f   : > { %v2125_v32 = vpop.eup %2124  ;;  %v528_v33 = vmul.f32 %v2123_v28, %v2323_v19  ;;  %2144 = vrcp.f32 %v443_v16 }
  0x30   : > { %v2127_v37 = vpop.eup %2126  ;;  %v529_v38 = vmul.f32 %v2125_v32, %v2326_v20  ;;  %2146 = vpow2.f32 %v2398_v8 }
  0x31   : > { %v2129_v19 = vpop.eup %2128  ;;  %v530_v45 = vmul.f32 %v2127_v37, %v2329_v21  ;;  %2148 = vpow2.f32 %v2430_v46  ;;  %v2507_v21 = vld [vmem:[%s3001_s3 + $0x30] sm:$0xff]  }
  0x32   : > { %v2131_v20 = vpop.eup %2130  ;;  %v2496_v8 = vpack.c.bf16 %v529_v38, %v528_v33  ;;  %v531_v58 = vmul.f32 %v2129_v19, %v2335_v25  ;;  %2150 = vpow2.f32 %v1746_v11  ;;  %v2515_v25 = vmul.f32 %v2280_v0, %v257_v44  ;;  %1968 = vmatprep.subr.bf16.mxu0 %v2507_v21 }
  0x33   : > { %v2133_v2 = vpop.eup %2132  ;;  %v532_v3 = vmul.f32 %v2131_v20, %v2338_v26  ;;  %2152 = vpow2.f32 %v1747_v12 }
  0x34   : > { %v2135_v46 = vpop.eup %2134  ;;  %806 = vrot.lane.b32.xlu0 %v2496_v8, %s2234_s17  ;;  %v2519_v7 = vpack.c.bf16 %v531_v58, %v530_v45  ;;  %v577_v9 = vshrl.u32 %v2496_v8, 16  ;;  %v580_v10 = vshll.u32 %v2496_v8, 16  ;;  %v533_v26 = vmul.f32 %v2133_v2, %v2341_v27 }
  0x35   : > { %v2137_v11 = vpop.eup %2136  ;;  %v534_v13 = vmul.f32 %v2135_v46, %v2351_v35  ;;  %v2536_v27 = vmul.f32 %v2280_v0, %v252_v1  ;;  %2154 = vpow2.f32 %v2461_v17  ;;  %v253_v1 = vld [vmem:[%s2300_s6 + $0xd8] sm:$0xff] }
  0x36   : > { %v2139_v16 = vpop.eup %2138  ;;  %v723_v24 = vrot.slane %v580_v10, 1  ;;  %v2532_v28 = vpack.c.bf16 %v533_v26, %v532_v3  ;;  %v584_v32 = vshrl.u32 %v2519_v7, 16  ;;  %v587_v12 = vshll.u32 %v2519_v7, 16 }
  0x37   : > { %v2141_v33 = vpop.eup %2140  ;;  %v535_v37 = vmul.f32 %v2137_v11, %v2357_v39  ;;  %v536_v38 = vmul.f32 %v2139_v16, %v2367_v47  ;;  %2156 = vrcp.f32 %v444_v52  ;;  %v2564_v52 = vadd.f32 %v2305_v4, %v289_v53 }
  0x38   : > { %v2143_v41 = vpop.eup %2142  ;;  %808 = vrot.lane.b32.xlu0 %v2519_v7, %s2234_s17  ;;  %v724_v42 = vor.u32 %v723_v24, %v577_v9  ;;  %v591_v44 = vshrl.u32 %v2532_v28, 16  ;;  %v594_v19 = vshll.u32 %v2532_v28, 16  ;;  %v725_v20 = vrot.slane %v587_v12, 1 }
  0x39   : > { %v2145_v45 = vpop.eup %2144  ;;  %v2554_v39 = vpack.c.bf16 %v535_v37, %v534_v13  ;;  %v537_v47 = vmul.f32 %v2141_v33, %v2370_v48  ;;  %v538_v17 = vmul.f32 %v2143_v41, %v2374_v50  ;;  %v2577_v16 = vadd.f32 %v2305_v4, %v290_v15 }
  0x3a   : > { %v2147_v58 = vpop.eup %2146  ;;  %v774_v59 = vsel %vm2540_vm2, %v724_v42, 0  ;;  %v727_v2 = vrot.slane %v594_v19, 1  ;;  %v539_v3 = vmul.f32 %v2145_v45, %v2377_v51  ;;  %v726_v46 = vor.u32 %v725_v20, %v584_v32 }
  0x3b   : > { %854 = vrot.lane.b32.xlu1 %v774_v59, %s2235_s20  ;;  %v2568_v48 = vpack.c.bf16 %v537_v47, %v536_v38  ;;  %v598_v50 = vshrl.u32 %v2554_v39, 16  ;;  %v601_v26 = vshll.u32 %v2554_v39, 16  ;;  %v2149_v11 = vpop.eup %2148  ;;  %v445_v53 = vadd.f32 1.0, %v2147_v58 }
  0x3c   : > { %810 = vrot.lane.b32.xlu0 %v2532_v28, %s2234_s17  ;;  %v728_v13 = vor.u32 %v727_v2, %v591_v44  ;;  %v2574_v51 = vpack.c.bf16 %v539_v3, %v538_v17  ;;  %v2151_v24 = vpop.eup %2150  ;;  %v579_v33 = vrot.slane %v577_v9, 7  ;;  %v775_v37 = vsel %vm2540_vm2, %v726_v46, 0 }
  0x3d   : > { %v729_v38 = vrot.slane %v601_v26, 1  ;;  %v292_v41 = vmul.f32 %v2280_v0, %v253_v1  ;;  %v605_v45 = vshrl.u32 %v2568_v48, 16  ;;  %v608_v20 = vshll.u32 %v2568_v48, 16  ;;  %v2153_v47 = vpop.eup %2152 }
  0x3e   : > { %v776_v42 = vsel %vm2540_vm2, %v728_v13, 0  ;;  %2158 = vrcp.f32 %v445_v53  ;;  %v586_v17 = vrot.slane %v584_v32, 7  ;;  %v593_v15 = vrot.slane %v591_v44, 7 }
  0x3f   : > { %856 = vrot.lane.b32.xlu1 %v775_v37, %s2235_s20  ;;  %v730_v9 = vor.u32 %v729_v38, %v598_v50  ;;  %v446_v58 = vadd.f32 1.0, %v2149_v11  ;;  %v731_v59 = vrot.slane %v608_v20, 1  ;;  %v615_v0 = vshll.u32 %v2574_v51, 16  ;;  %v2155_v1 = vpop.eup %2154 }
  0x40   : > { %858 = vrot.lane.b32.xlu0 %v776_v42, %s2235_s20  ;;  %v447_v2 = vadd.f32 1.0, %v2151_v24  ;;  %v448_v3 = vadd.f32 1.0, %v2153_v47  ;;  %v600_v46 = vrot.slane %v598_v50, 7  ;;  %v612_v13 = vshrl.u32 %v2574_v51, 16 }
  0x41   : > { %2160 = vrcp.f32 %v446_v58  ;;  %v2592_v32 = vadd.f32 %v2305_v4, %v2493_v55  ;;  %v2157_v53 = vpop.eup %2156  ;;  %v732_v44 = vor.u32 %v731_v59, %v605_v45  ;;  %v449_v11 = vadd.f32 1.0, %v2155_v1 }
  0x42   : > { %2162 = vrcp.f32 %v447_v2  ;;  %v2596_v37 = vadd.f32 %v2305_v4, %v2515_v25  ;;  %v607_v24 = vrot.slane %v605_v45, 7  ;;  %v614_v50 = vrot.slane %v612_v13, 7 }
  0x43   : > { %812 = vrot.lane.b32.xlu1 %v2554_v39, %s2234_s17  ;;  %2164 = vrcp.f32 %v448_v3  ;;  %v2602_v38 = vor.u32 %v580_v10, %v579_v33  ;;  %v777_v55 = vsel %vm2540_vm2, %v730_v9, 0  ;;  %v733_v42 = vrot.slane %v615_v0, 1 }
  0x44   : > { %814 = vrot.lane.b32.xlu0 %v2568_v48, %s2234_s17  ;;  %2166 = vrcp.f32 %v449_v11  ;;  %v2610_v25 = vor.u32 %v587_v12, %v586_v17  ;;  %v778_v39 = vsel %vm2540_vm2, %v732_v44, 0  ;;  %v2617_v8 = vadd.f32 %v2305_v4, %v2536_v27 }
  0x45   : > { %2168 = vpow2.f32 %v2464_v18  ;;  %v540_v10 = vmul.f32 %v2157_v53, %v2382_v54  ;;  %v1755_v48 = vmul.f32 -1.442695, %v2564_v52  ;;  %v2623_v33 = vadd.f32 %v2305_v4, %v292_v41 }
  0x46   : > { %2170 = vpow2.f32 %v2470_v29  ;;  %v2236_v7 = vmov 0   ;;  %v2630_v18 = vor.u32 %v594_v19, %v593_v15  ;;  %v2632_v27 = vor.u32 %v601_v26, %v600_v46 }
  0x47   : > { %1936 = vmatprep.mubr.bf16.mxu0 %v2236_v7  ;;  %860 = vrot.lane.b32.xlu1 %v777_v55, %s2235_s20  ;;  %2172 = vpow2.f32 %v2473_v30  ;;  %v2634_v54 = vor.u32 %v608_v20, %v607_v24  ;;  %v734_v4 = vor.u32 %v733_v42, %v612_v13  ;;  %v1756_v12 = vmul.f32 -1.442695, %v2577_v16 }
  0x48   : > { %v2159_v29 = vpop.eup %2158  ;;  %862 = vrot.lane.b32.xlu0 %v778_v39, %s2235_s20  ;;  %2174 = vpow2.f32 %v2476_v31  ;;  %v2639_v41 = vor.u32 %v615_v0, %v614_v50  ;;  %v1757_v28 = vmul.f32 -1.442695, %v2617_v8  ;;  %v1758_v19 = vmul.f32 -1.442695, %v2623_v33 }
  0x49   : > { %v541_v30 = vmul.f32 %v2159_v29, %v2390_v60  ;;  %2176 = vpow2.f32 %v2483_v36  ;;  %v779_v20 = vsel %vm2540_vm2, %v734_v4, 0  ;;  %v1759_v36 = vmul.f32 -1.442695, %v2502_v63 }
  0x4a   : > { %2178 = vpow2.f32 %v2527_v14  ;;  %v708_v35 = vsel %vm2725_vm5, 0, %v2610_v25 }
  0x4b   : > { %v2161_v26 = vpop.eup %2160  ;;  %816 = vrot.lane.b32.xlu1 %v2574_v51, %s2234_s17  ;;  %v566_v45 = vpack.c.bf16 %v541_v30, %v540_v10  ;;  %2180 = vpow2.f32 %v1755_v48 }
  0x4c   : > { %v2163_v31 = vpop.eup %2162  ;;  %v542_v60 = vmul.f32 %v2161_v26, %v2407_v22  ;;  %2182 = vpow2.f32 %v1756_v12 }
  0x4d   : > { %v2165_v47 = vpop.eup %2164  ;;  %818 = vrot.lane.b32.xlu0 %v566_v45, %s2234_s17  ;;  %v619_v14 = vshrl.u32 %v566_v45, 16  ;;  %v622_v17 = vshll.u32 %v566_v45, 16  ;;  %v543_v15 = vmul.f32 %v2163_v31, %v2410_v23  ;;  %2184 = vpow2.f32 %v1757_v28 }
  0x4e   : > { %v2167_v51 = vpop.eup %2166  ;;  %v544_v9 = vmul.f32 %v2165_v47, %v2418_v40  ;;  %2186 = vpow2.f32 %v1758_v19 }
  0x4f   : > { %v2169_v58 = vpop.eup %2168  ;;  %864 = vrot.lane.b32.xlu1 %v779_v20, %s2235_s20  ;;  %v621_v59 = vrot.slane %v619_v14, 7  ;;  %v735_v22 = vrot.slane %v622_v17, 1  ;;  %v567_v0 = vpack.c.bf16 %v543_v15, %v542_v60  ;;  %v545_v2 = vmul.f32 %v2167_v51, %v2433_v49 }
  0x50   : > { %v2171_v3 = vpop.eup %2170  ;;  %v450_v1 = vadd.f32 1.0, %v2169_v58  ;;  %2188 = vpow2.f32 %v1759_v36 }
  0x51   : > { %v2173_v46 = vpop.eup %2172  ;;  %v736_v13 = vor.u32 %v735_v22, %v619_v14  ;;  %v568_v53 = vpack.c.bf16 %v545_v2, %v544_v9  ;;  %v626_v23 = vshrl.u32 %v567_v0, 16  ;;  %v629_v44 = vshll.u32 %v567_v0, 16 }
  0x52   : > { %v2175_v11 = vpop.eup %2174  ;;  %v451_v24 = vadd.f32 1.0, %v2171_v3  ;;  %2190 = vrcp.f32 %v450_v1  ;;  %v452_v40 = vadd.f32 1.0, %v2173_v46  ;;  %v2657_v50 = vor.u32 %v622_v17, %v621_v59 }
  0x53   : > { %v2177_v55 = vpop.eup %2176  ;;  %v780_v42 = vsel %vm2540_vm2, %v736_v13, 0  ;;  %820 = vrot.lane.b32.xlu1 %v567_v0, %s2234_s17  ;;  %v628_v49 = vrot.slane %v626_v23, 7  ;;  %v737_v39 = vrot.slane %v629_v44, 1  ;;  %v633_v10 = vshrl.u32 %v568_v53, 16 }
  0x54   : > { %v2179_v48 = vpop.eup %2178  ;;  %866 = vrot.lane.b32.xlu0 %v780_v42, %s2235_s20  ;;  %v636_v29 = vshll.u32 %v568_v53, 16  ;;  %2192 = vrcp.f32 %v451_v24  ;;  %v453_v4 = vadd.f32 1.0, %v2175_v11  ;;  %v454_v12 = vadd.f32 1.0, %v2177_v55 }
  0x55   : > { %v2181_v30 = vpop.eup %2180  ;;  %v738_v28 = vor.u32 %v737_v39, %v626_v23  ;;  %v635_v19 = vrot.slane %v633_v10, 7  ;;  %2194 = vrcp.f32 %v452_v40  ;;  %v455_v26 = vadd.f32 1.0, %v2179_v48 }
  0x56   : > { %v2183_v45 = vpop.eup %2182  ;;  %v739_v31 = vrot.slane %v636_v29, 1  ;;  %2196 = vrcp.f32 %v453_v4  ;;  %v456_v20 = vadd.f32 1.0, %v2181_v30  ;;  %v2665_v14 = vor.u32 %v629_v44, %v628_v49 }
  0x57   : > { %v2185_v60 = vpop.eup %2184  ;;  %v781_v36 = vsel %vm2540_vm2, %v738_v28, 0  ;;  %2198 = vrcp.f32 %v454_v12  ;;  %v457_v47 = vadd.f32 1.0, %v2183_v45  ;;  %v2669_v9 = vor.u32 %v636_v29, %v635_v19 }
  0x58   : > { %v2187_v17 = vpop.eup %2186  ;;  %822 = vrot.lane.b32.xlu0 %v568_v53, %s2234_s17  ;;  %868 = vrot.lane.b32.xlu1 %v781_v36, %s2235_s20  ;;  %v740_v15 = vor.u32 %v739_v31, %v633_v10  ;;  %2200 = vrcp.f32 %v455_v26  ;;  %v458_v51 = vadd.f32 1.0, %v2185_v60  ;;  %v1760_v59 = vmul.f32 -1.442695, %v2512_v6 }
  0x59   : > { %2202 = vrcp.f32 %v456_v20  ;;  %v459_v58 = vadd.f32 1.0, %v2187_v17  ;;  %v1761_v2 = vmul.f32 -1.442695, %v2592_v32  ;;  %v1762_v1 = vmul.f32 -1.442695, %v2596_v37 }
  0x5a   : > { %v2189_v22 = vpop.eup %2188  ;;  %v782_v0 = vsel %vm2540_vm2, %v740_v15, 0  ;;  %2204 = vrcp.f32 %v457_v47 }
  0x5b   : > { %2206 = vrcp.f32 %v458_v51  ;;  %v460_v39 = vadd.f32 1.0, %v2189_v22 }
  0x5c   : > { %v2191_v3 = vpop.eup %2190  ;;  %870 = vrot.lane.b32.xlu0 %v782_v0, %s2235_s20  ;;  %2208 = vrcp.f32 %v459_v58 }
  0x5d   : > { %v546_v46 = vmul.f32 %v2191_v3, %v2437_v56  ;;  %2210 = vpow2.f32 %v1760_v59 }
  0x5e   : > { %v2193_v13 = vpop.eup %2192  ;;  %2212 = vpow2.f32 %v1761_v2 }
  0x5f   : > { %v2195_v53 = vpop.eup %2194  ;;  %v547_v23 = vmul.f32 %v2193_v13, %v2440_v57  ;;  %2214 = vpow2.f32 %v1762_v1 }
  0x60   : > { %v2197_v44 = vpop.eup %2196  ;;  %v548_v11 = vmul.f32 %v2195_v53, %v2444_v61  ;;  %2216 = vrcp.f32 %v460_v39 }
  0x61   : > { %v2199_v24 = vpop.eup %2198  ;;  %v569_v40 = vpack.c.bf16 %v547_v23, %v546_v46  ;;  %v549_v55 = vmul.f32 %v2197_v44, %v2447_v62 }
  0x62   : > { %v2201_v42 = vpop.eup %2200  ;;  %v550_v49 = vmul.f32 %v2199_v24, %v2452_v5 }
  0x63   : > { %v2203_v10 = vpop.eup %2202  ;;  %824 = vrot.lane.b32.xlu1 %v569_v40, %s2234_s17  ;;  %v570_v56 = vpack.c.bf16 %v549_v55, %v548_v11  ;;  %v640_v48 = vshrl.u32 %v569_v40, 16  ;;  %v643_v29 = vshll.u32 %v569_v40, 16  ;;  %v551_v57 = vmul.f32 %v2201_v42, %v2480_v34 }
  0x64   : > { %v2205_v4 = vpop.eup %2204  ;;  %v552_v61 = vmul.f32 %v2203_v10, %v2564_v52 }
  0x65   : > { %v2207_v12 = vpop.eup %2206  ;;  %826 = vrot.lane.b32.xlu0 %v570_v56, %s2234_s17  ;;  %v741_v30 = vrot.slane %v643_v29, 1  ;;  %v647_v62 = vshrl.u32 %v570_v56, 16  ;;  %v650_v28 = vshll.u32 %v570_v56, 16  ;;  %v571_v5 = vpack.c.bf16 %v551_v57, %v550_v49 }
  0x66   : > { %v2209_v19 = vpop.eup %2208  ;;  %v553_v26 = vmul.f32 %v2205_v4, %v2577_v16  ;;  %v554_v45 = vmul.f32 %v2207_v12, %v2617_v8  ;;  %v642_v20 = vrot.slane %v640_v48, 7 }
  0x67   : > { %v2211_v31 = vpop.eup %2210  ;;  %v742_v60 = vor.u32 %v741_v30, %v640_v48  ;;  %v743_v34 = vrot.slane %v650_v28, 1  ;;  %v555_v36 = vmul.f32 %v2209_v19, %v2623_v33  ;;  %v654_v47 = vshrl.u32 %v571_v5, 16 }
  0x68   : > { %v572_v52 = vpack.c.bf16 %v553_v26, %v552_v61  ;;  %v657_v17 = vshll.u32 %v571_v5, 16  ;;  %v461_v15 = vadd.f32 1.0, %v2211_v31  ;;  %v2213_v51 = vpop.eup %2212  ;;  %v649_v59 = vrot.slane %v647_v62, 7 }
  0x69   : > { %v783_v58 = vsel %vm2540_vm2, %v742_v60, 0  ;;  %v744_v22 = vor.u32 %v743_v34, %v647_v62  ;;  %v573_v16 = vpack.c.bf16 %v555_v36, %v554_v45  ;;  %v2215_v0 = vpop.eup %2214  ;;  %v656_v8 = vrot.slane %v654_v47, 7 }
  0x6a   : > { %872 = vrot.lane.b32.xlu1 %v783_v58, %s2235_s20  ;;  %v745_v2 = vrot.slane %v657_v17, 1  ;;  %v661_v3 = vshrl.u32 %v572_v52, 16  ;;  %v664_v1 = vshll.u32 %v572_v52, 16  ;;  %2218 = vrcp.f32 %v461_v15  ;;  %v2217_v48 = vpop.eup %2216 }
  0x6b   : > { %v784_v33 = vsel %vm2540_vm2, %v744_v22, 0  ;;  %v668_v46 = vshrl.u32 %v573_v16, 16  ;;  %v671_v13 = vshll.u32 %v573_v16, 16  ;;  %v462_v11 = vadd.f32 1.0, %v2213_v51 }
  0x6c   : > { %874 = vrot.lane.b32.xlu0 %v784_v33, %s2235_s20  ;;  %v746_v53 = vor.u32 %v745_v2, %v654_v47  ;;  %v663_v23 = vrot.slane %v661_v3, 7  ;;  %v747_v44 = vrot.slane %v664_v1, 1  ;;  %v463_v40 = vadd.f32 1.0, %v2215_v0 }
  0x6d   : > { %v670_v24 = vrot.slane %v668_v46, 7  ;;  %v2695_v55 = vor.u32 %v643_v29, %v642_v20  ;;  %2220 = vrcp.f32 %v462_v11  ;;  %v2698_v49 = vor.u32 %v650_v28, %v649_v59 }
  0x6e   : > { %828 = vrot.lane.b32.xlu1 %v571_v5, %s2234_s17  ;;  %v748_v42 = vor.u32 %v747_v44, %v661_v3  ;;  %v785_v39 = vsel %vm2540_vm2, %v746_v53, 0  ;;  %v749_v10 = vrot.slane %v671_v13, 1  ;;  %2222 = vrcp.f32 %v463_v40 }
  0x6f   : > { %v2702_v56 = vor.u32 %v657_v17, %v656_v8  ;;  %v2705_v57 = vor.u32 %v664_v1, %v663_v23  ;;  %v2707_v29 = vor.u32 %v671_v13, %v670_v24  ;;  %v556_v12 = vmul.f32 %v2217_v48, %v2502_v63  ;;  %v2094_v13 = vld [vmem:[%s3001_s3 + $0x38] sm:$0xff]   ;;  %v2095_v24 = vld [vmem:[%s3001_s3 + $0x40] sm:$0xff]  }
  0x70   : > { %830 = vrot.lane.b32.xlu0 %v572_v52, %s2234_s17  ;;  %v786_v4 = vsel %vm2540_vm2, %v748_v42, 0  ;;  %v750_v61 = vor.u32 %v749_v10, %v668_v46  ;;  %v707_v2 = vsel %vm2725_vm5, 0, %v2602_v38  ;;  %v709_v46 = vsel %vm2725_vm5, 0, %v2630_v18  ;;  %v2224_v42 = vld [vmem:[%s3001_s3] sm:$0xff]   ;;  %v2225_v10 = vld [vmem:[%s3001_s3 + $0x8] sm:$0xff]  }
  0x71   : > { %v710_v48 = vsel %vm2725_vm5, 0, %v2632_v27 }
  0x72   : > { %876 = vrot.lane.b32.xlu1 %v785_v39, %s2235_s20  ;;  %v787_v28 = vsel %vm2540_vm2, %v750_v61, 0  ;;  %v711_v39 = vsel %vm2725_vm5, 0, %v2634_v54 }
  0x74   : > { %878 = vrot.lane.b32.xlu0 %v786_v4, %s2235_s20  ;;  %v2219_v30 = vpop.eup %2218 }
  0x75   : > { %v557_v62 = vmul.f32 %v2219_v30, %v2512_v6 }
  0x76   : > { %832 = vrot.lane.b32.xlu1 %v573_v16, %s2234_s17 }
  0x77   : > { %v2221_v19 = vpop.eup %2220  ;;  %v574_v5 = vpack.c.bf16 %v557_v62, %v556_v12 }
  0x78   : > { %v2223_v26 = vpop.eup %2222  ;;  %v558_v45 = vmul.f32 %v2221_v19, %v2592_v32  ;;  %v712_v19 = vsel %vm2725_vm5, 0, %v2639_v41 }
  0x79   : > { %834 = vrot.lane.b32.xlu0 %v574_v5, %s2234_s17  ;;  %v675_v31 = vshrl.u32 %v574_v5, 16  ;;  %v678_v20 = vshll.u32 %v574_v5, 16  ;;  %v559_v63 = vmul.f32 %v2223_v26, %v2596_v37 }
  0x7a   : > { %880 = vrot.lane.b32.xlu1 %v787_v28, %s2235_s20 }
  0x7b   : > { %v677_v60 = vrot.slane %v675_v31, 7  ;;  %v751_v34 = vrot.slane %v678_v20, 1  ;;  %v575_v6 = vpack.c.bf16 %v559_v63, %v558_v45  ;;  %v713_v45 = vsel %vm2725_vm5, 0, %v2657_v50 }
  0x7c   : > { %v715_v50 = vsel %vm2725_vm5, 0, %v2669_v9 }
  0x7d   : > { %v752_v36 = vor.u32 %v751_v34, %v675_v31  ;;  %v682_v52 = vshrl.u32 %v575_v6, 16  ;;  %v685_v47 = vshll.u32 %v575_v6, 16  ;;  %v2723_v17 = vor.u32 %v678_v20, %v677_v60 }
  0x7e   : > { %836 = vrot.lane.b32.xlu1 %v575_v6, %s2234_s17  ;;  %v714_v34 = vsel %vm2725_vm5, 0, %v2665_v14 }
  0x7f   : > { %v788_v15 = vsel %vm2540_vm2, %v752_v36, 0  ;;  %v684_v37 = vrot.slane %v682_v52, 7  ;;  %v753_v51 = vrot.slane %v685_v47, 1  ;;  %v721_v58 = vsel %vm2725_vm5, 0, %v2723_v17 }
  0x80   : > { %882 = vrot.lane.b32.xlu0 %v788_v15, %s2235_s20 }
  0x81   : > { %v754_v59 = vor.u32 %v753_v51, %v682_v52  ;;  %v2735_v22 = vor.u32 %v685_v47, %v684_v37 }
  0x83   : > { %v789_v16 = vsel %vm2540_vm2, %v754_v59, 0  ;;  %v722_v0 = vsel %vm2725_vm5, 0, %v2735_v22  ;;  %v716_v59 = vsel %vm2725_vm5, 0, %v2695_v55  ;;  %v718_v55 = vsel %vm2725_vm5, 0, %v2702_v56 }
  0x84   : > { %884 = vrot.lane.b32.xlu1 %v789_v16, %s2235_s20  ;;  %v717_v16 = vsel %vm2725_vm5, 0, %v2698_v49  ;;  %v719_v49 = vsel %vm2725_vm5, 0, %v2705_v57  ;;  %v720_v57 = vsel %vm2725_vm5, 0, %v2707_v29 }
  0xa6   : > { %v807_v8 = vpop.permute.xlu0 %806 }
  0xa7   : > { %v889_v1 = vsel %vm886_vm6, %v707_v2, %v807_v8 }
  0xaa   : > { %v809_v3 = vpop.permute.xlu0 %808 }
  0xab   : > { %v892_v23 = vsel %vm886_vm6, %v708_v35, %v809_v3 }
  0xad   : > { %v855_v33 = vpop.permute.xlu1 %854 }
  0xae   : > { %v937_v38 = vsel %vm935_vm7, %v889_v1, %v855_v33  ;;  %v811_v53 = vpop.permute.xlu0 %810 }
  0xaf   : > { %1898 = vmatprep.mubr.msk.bf16.mxu1 %vm999_vm8, %v937_v38  ;;  %1937 = vmatmul.mubr.msk.bf16.vlgmr.msra.gmra.mrb[0].mxu0 %vm999_vm8, %v937_v38  ;;  %v895_v25 = vsel %vm886_vm6, %v709_v46, %v811_v53 }
  0xb0   : > { %1969 = vmatpush3.bf16.msra.mxu0 %v2507_v21 }
  0xb1   : > { %v857_v44 = vpop.permute.xlu1 %856  ;;  %1970 = vmatprep.subr.bf16.mxu0 %v2094_v13 }
  0xb2   : > { %v939_v18 = vsel %vm935_vm7, %v892_v23, %v857_v44  ;;  %v859_v11 = vpop.permute.xlu0 %858 }
  0xb3   : > { %1899 = vmatmul.mubr.msk.bf16.vlgmr.msra.gmra.mrb[0].mxu1 %vm999_vm8, %v939_v18  ;;  %1940 = vmatprep.mubr.msk.bf16.mxu0 %vm999_vm8, %v939_v18  ;;  %v941_v40 = vsel %vm935_vm7, %v895_v25, %v859_v11 }
  0xb4   : > { %2009 = vmatpush3.bf16.msra.mxu1 %v2224_v42  ;;  %1902 = vmatprep.mubr.msk.bf16.mxu1 %vm999_vm8, %v941_v40 }
  0xb5   : > { %v813_v21 = vpop.permute.xlu1 %812  ;;  %1971 = vmatpush3.bf16.msra.mxu0 %v2094_v13  ;;  %2007 = vmatprep.subr.bf16.mxu1 %v2225_v10 }
  0xb6   : > { %v815_v4 = vpop.permute.xlu0 %814  ;;  %1972 = vmatprep.subr.bf16.mxu0 %v2095_v24  ;;  %v898_v12 = vsel %vm886_vm6, %v710_v48, %v813_v21 }
  0xb7   : > { %1941 = vmatmul.mubr.msk.bf16.gmra.mrb[4].mxu0 %vm999_vm8, %v941_v40  ;;  %v901_v61 = vsel %vm886_vm6, %v711_v39, %v815_v4 }
  0xb8   : > { %2010 = vmatpush3.bf16.msra.mxu1 %v2225_v10 }
  0xb9   : > { %v861_v54 = vpop.permute.xlu1 %860  ;;  %1973 = vmatpush3.bf16.msra.mxu0 %v2095_v24  ;;  %2008 = vmatprep.subr.bf16.mxu1 %v2427_v43 }
  0xba   : > { %v943_v30 = vsel %vm935_vm7, %v898_v12, %v861_v54  ;;  %v863_v62 = vpop.permute.xlu0 %862 }
  0xbb   : > { %1903 = vmatmul.mubr.msk.bf16.gmra.mrb[4].mxu1 %vm999_vm8, %v943_v30  ;;  %1944 = vmatprep.mubr.msk.bf16.mxu0 %vm999_vm8, %v943_v30  ;;  %v945_v27 = vsel %vm935_vm7, %v901_v61, %v863_v62 }
  0xbc   : > { %1906 = vmatprep.mubr.msk.bf16.mxu1 %vm999_vm8, %v945_v27  ;;  %2011 = vmatpush3.bf16.msra.mxu1 %v2427_v43 }
  0xbd   : > { %v817_v28 = vpop.permute.xlu1 %816 }
  0xbe   : > { %v904_v26 = vsel %vm886_vm6, %v712_v19, %v817_v28 }
  0xbf   : > { %1945 = vmatmul.mubr.msk.bf16.gmra.mrb[8].mxu0 %vm999_vm8, %v945_v27  ;;  %v819_v5 = vpop.permute.xlu0 %818 }
  0xc0   : > { %v907_v43 = vsel %vm886_vm6, %v713_v45, %v819_v5 }
  0xc1   : > { %v865_v31 = vpop.permute.xlu1 %864 }
  0xc2   : > { %v947_v20 = vsel %vm935_vm7, %v904_v26, %v865_v31 }
  0xc3   : > { %1907 = vmatmul.mubr.msk.bf16.gmra.mrb[8].mxu1 %vm999_vm8, %v947_v20  ;;  %1948 = vmatprep.mubr.msk.bf16.mxu0 %vm999_vm8, %v947_v20 }
  0xc5   : > { %v821_v63 = vpop.permute.xlu1 %820 }
  0xc6   : > { %v867_v41 = vpop.permute.xlu0 %866  ;;  %v910_v6 = vsel %vm886_vm6, %v714_v34, %v821_v63 }
  0xc7   : > { %v949_v60 = vsel %vm935_vm7, %v907_v43, %v867_v41 }
  0xc8   : > { %1910 = vmatprep.mubr.msk.bf16.mxu1 %vm999_vm8, %v949_v60  ;;  %1949 = vmatmul.mubr.msk.bf16.gmra.mrb[12].mxu0 %vm999_vm8, %v949_v60 }
  0xc9   : > { %1974 = vmatprep.mubr.msk.bf16.mxu0 %vm999_vm8, %v939_v18 }
  0xca   : > { %v823_v36 = vpop.permute.xlu0 %822  ;;  %v869_v52 = vpop.permute.xlu1 %868 }
  0xcb   : > { %v951_v47 = vsel %vm935_vm7, %v910_v6, %v869_v52  ;;  %v913_v15 = vsel %vm886_vm6, %v715_v50, %v823_v36 }
  0xcc   : > { %1911 = vmatmul.mubr.msk.bf16.gmra.mrb[12].mxu1 %vm999_vm8, %v951_v47 }
  0xce   : > { %v871_v14 = vpop.permute.xlu0 %870 }
  0xcf   : > { %v953_v37 = vsel %vm935_vm7, %v913_v15, %v871_v14 }
  0xd0   : > { %1914 = vmatprep.mubr.msk.bf16.mxu1 %vm999_vm8, %v953_v37  ;;  %1975 = vmatmul.mubr.msk.bf16.vlgmr.msra.gmra.mrb[0].mxu0 %vm999_vm8, %v941_v40 }
  0xd1   : > { %1978 = vmatprep.mubr.msk.bf16.mxu0 %vm999_vm8, %v943_v30 }
  0xd5   : > { %v825_v9 = vpop.permute.xlu1 %824 }
  0xd6   : > { %v916_v8 = vsel %vm886_vm6, %v716_v59, %v825_v9 }
  0xd7   : > { %v827_v51 = vpop.permute.xlu0 %826 }
  0xd8   : > { %1979 = vmatmul.mubr.msk.bf16.gmra.mrb[4].mxu0 %vm999_vm8, %v945_v27  ;;  %v919_v2 = vsel %vm886_vm6, %v717_v16, %v827_v51 }
  0xd9   : > { %1982 = vmatprep.mubr.msk.bf16.mxu0 %vm999_vm8, %v947_v20  ;;  %v2890_v20 = vld [vmem:[%s3002_s4] ss:$0 sm:$0xff] }
  0xdc   : > { %v873_v3 = vpop.permute.xlu1 %872 }
  0xdd   : > { %v955_v1 = vsel %vm935_vm7, %v916_v8, %v873_v3 }
  0xde   : > { %1915 = vmatmul.mubr.msk.bf16.gmra.mrb[16].mxu1 %vm999_vm8, %v955_v1  ;;  %v875_v35 = vpop.permute.xlu0 %874 }
  0xdf   : > { %v957_v33 = vsel %vm935_vm7, %v919_v2, %v875_v35 }
  0xe0   : > { %v829_v46 = vpop.permute.xlu1 %828  ;;  %1918 = vmatprep.mubr.msk.bf16.mxu1 %vm999_vm8, %v957_v33  ;;  %1983 = vmatmul.mubr.msk.bf16.gmra.mrb[8].mxu0 %vm999_vm8, %v949_v60 }
  0xe1   : > { %1986 = vmatprep.mubr.msk.bf16.mxu0 %vm999_vm8, %v951_v47  ;;  %v922_v38 = vsel %vm886_vm6, %v718_v55, %v829_v46 }
  0xe2   : > { %v831_v13 = vpop.permute.xlu0 %830 }
  0xe3   : > { %v925_v53 = vsel %vm886_vm6, %v719_v49, %v831_v13 }
  0xe4   : > { %v877_v23 = vpop.permute.xlu1 %876 }
  0xe5   : > { %v959_v25 = vsel %vm935_vm7, %v922_v38, %v877_v23 }
  0xe6   : > { %1919 = vmatmul.mubr.msk.bf16.gmra.mrb[20].mxu1 %vm999_vm8, %v959_v25  ;;  %v879_v44 = vpop.permute.xlu0 %878 }
  0xe7   : > { %v961_v18 = vsel %vm935_vm7, %v925_v53, %v879_v44 }
  0xe8   : > { %v833_v56 = vpop.permute.xlu1 %832  ;;  %1922 = vmatprep.mubr.msk.bf16.mxu1 %vm999_vm8, %v961_v18  ;;  %1987 = vmatmul.mubr.msk.bf16.gmra.mrb[12].mxu0 %vm999_vm8, %v953_v37 }
  0xe9   : > { %1990 = vmatprep.mubr.msk.bf16.mxu0 %vm999_vm8, %v955_v1  ;;  %v928_v11 = vsel %vm886_vm6, %v720_v57, %v833_v56 }
  0xeb   : > { %v835_v40 = vpop.permute.xlu0 %834 }
  0xec   : > { %v881_v24 = vpop.permute.xlu1 %880  ;;  %v931_v21 = vsel %vm886_vm6, %v721_v58, %v835_v40 }
  0xed   : > { %v963_v42 = vsel %vm935_vm7, %v928_v11, %v881_v24 }
  0xee   : > { %1923 = vmatmul.mubr.msk.bf16.gmra.mrb[24].mxu1 %vm999_vm8, %v963_v42 }
  0xf0   : > { %1991 = vmatmul.mubr.msk.bf16.gmra.mrb[16].mxu0 %vm999_vm8, %v957_v33  ;;  %v837_v39 = vpop.permute.xlu1 %836 }
  0xf1   : > { %1994 = vmatprep.mubr.msk.bf16.mxu0 %vm999_vm8, %v959_v25  ;;  %v934_v48 = vsel %vm886_vm6, %v722_v0, %v837_v39 }
  0xf2   : > { %v883_v29 = vpop.permute.xlu0 %882 }
  0xf3   : > { %v965_v10 = vsel %vm935_vm7, %v931_v21, %v883_v29 }
  0xf4   : > { %1926 = vmatprep.mubr.msk.bf16.mxu1 %vm999_vm8, %v965_v10 }
  0xf6   : > { %v885_v4 = vpop.permute.xlu1 %884 }
  0xf7   : > { %v967_v61 = vsel %vm935_vm7, %v934_v48, %v885_v4 }
  0xf8   : > { %1995 = vmatmul.mubr.msk.bf16.gmra.mrb[20].mxu0 %vm999_vm8, %v961_v18  ;;  %1927 = vmatmul.mubr.msk.bf16.gmra.mrb[28].mxu1 %vm999_vm8, %v967_v61 }
  0xf9   : > { %1998 = vmatprep.mubr.msk.bf16.mxu0 %vm999_vm8, %v963_v42  ;;  %1952 = vmatprep.mubr.msk.bf16.mxu1 %vm999_vm8, %v951_v47 }
 0x100   : > { %1999 = vmatmul.mubr.msk.bf16.gmra.mrb[24].mxu0 %vm999_vm8, %v965_v10  ;;  %1953 = vmatmul.mubr.msk.bf16.vlgmr.msra.gmra.mrb[16].mxu1 %vm999_vm8, %v953_v37 }
 0x101   : > { %2002 = vmatprep.mubr.msk.bf16.mxu0 %vm999_vm8, %v967_v61  ;;  %1956 = vmatprep.mubr.msk.bf16.mxu1 %vm999_vm8, %v955_v1 }
 0x108   : > { %2003 = vmatmul.mubr.bf16.gmra.mrb[28].mxu0 %v2236_v7  ;;  %1957 = vmatmul.mubr.msk.bf16.gmra.mrb[20].mxu1 %vm999_vm8, %v957_v33 }
 0x109   : > { %1960 = vmatprep.mubr.msk.bf16.mxu1 %vm999_vm8, %v959_v25 }
 0x110   : > { %1961 = vmatmul.mubr.msk.bf16.gmra.mrb[24].mxu1 %vm999_vm8, %v961_v18 }
 0x111   : > { %1964 = vmatprep.mubr.msk.bf16.mxu1 %vm999_vm8, %v963_v42 }
 0x118   : > { %1965 = vmatmul.mubr.msk.bf16.gmra.mrb[28].mxu1 %vm999_vm8, %v965_v10 }
 0x186   : > { %v1900_v17 = vpop.f32.mrb[0].mxu1 }
 0x187   : > { %v1066_v32 = vpop.f32.mrb[1].mxu1 }
 0x188   : > { %v1901_v58 = vpop.f32.mrb[2].mxu1 }
 0x189   : > { %v1069_v22 = vpop.f32.mrb[3].mxu1 }
 0x18e   : > { %v1904_v0 = vpop.f32.mrb[4].mxu1 }
 0x18f   : > { %v1082_v12 = vpop.f32.mrb[5].mxu1 }
 0x190   : > { %v1905_v54 = vpop.f32.mrb[6].mxu1 }
 0x191   : > { %v1085_v30 = vpop.f32.mrb[7].mxu1 }
 0x196   : > { %v1908_v7 = vpop.f32.mrb[8].mxu1 }
 0x197   : > { %v1098_v62 = vpop.f32.mrb[9].mxu1 }
 0x198   : > { %v1909_v27 = vpop.f32.mrb[10].mxu1 }
 0x199   : > { %v1101_v28 = vpop.f32.mrb[11].mxu1 }
 0x19f   : > { %v1912_v19 = vpop.f32.mrb[12].mxu1 }
 0x1a0   : > { %v1114_v5 = vpop.f32.mrb[13].mxu1 }
 0x1a1   : > { %v1913_v26 = vpop.f32.mrb[14].mxu1 }
 0x1a2   : > { %v1117_v45 = vpop.f32.mrb[15].mxu1 }
 0x1a3   : > { %v1976_v31 = vpop.f32.mrb[0].mxu0 }
 0x1a4   : > { %v2012_v43 = vadd.f32 %v1976_v31, %v1900_v17  ;;  %v1434_v63 = vpop.f32.mrb[1].mxu0 }
 0x1a5   : > { %v2013_v41 = vadd.f32 %v1434_v63, %v1066_v32  ;;  %v1977_v60 = vpop.f32.mrb[2].mxu0 }
 0x1a6   : > { %v1602_v34 = vadd.f32 %v2012_v43, %v2890_v20  ;;  %v2014_v50 = vadd.f32 %v1977_v60, %v1901_v58  ;;  %v1437_v6 = vpop.f32.mrb[3].mxu0 }
 0x1a7   : > { %v1600_v36 = vadd.f32 %v2013_v41, %v2890_v20  ;;  %v2015_v52 = vadd.f32 %v1437_v6, %v1069_v22 }
 0x1a8   : > { %1635 = vst.msk [vmem:[%s2897_s9 + $0x10] sm:$0xff] %vm1632_vm9, %v1602_v34  ;;  %v1603_v47 = vadd.f32 %v2014_v50, %v2890_v20 }
 0x1a9   : > { %1633 = vst.msk [vmem:[%s2897_s9] sm:$0xff] %vm1632_vm9, %v1600_v36  ;;  %v1601_v15 = vadd.f32 %v2015_v52, %v2890_v20 }
 0x1aa   : > { %1636 = vst.msk [vmem:[%s2897_s9 + $0x18] sm:$0xff] %vm1632_vm9, %v1603_v47 }
 0x1ab   : > { %1634 = vst.msk [vmem:[%s2897_s9 + $0x8] sm:$0xff] %vm1632_vm9, %v1601_v15  ;;  %v1980_v14 = vpop.f32.mrb[4].mxu0 }
 0x1ac   : > { %v2016_v37 = vadd.f32 %v1980_v14, %v1904_v0  ;;  %v1450_v9 = vpop.f32.mrb[5].mxu0 }
 0x1ad   : > { %v2017_v51 = vadd.f32 %v1450_v9, %v1082_v12  ;;  %v1981_v59 = vpop.f32.mrb[6].mxu0 }
 0x1ae   : > { %v1606_v16 = vadd.f32 %v2016_v37, %v2890_v20  ;;  %v2018_v8 = vadd.f32 %v1981_v59, %v1905_v54  ;;  %v1453_v2 = vpop.f32.mrb[7].mxu0 }
 0x1af   : > { %v1604_v3 = vadd.f32 %v2017_v51, %v2890_v20  ;;  %v2019_v1 = vadd.f32 %v1453_v2, %v1085_v30 }
 0x1b0   : > { %1639 = vst.msk [vmem:[%s2897_s9 + $0x30] sm:$0xff] %vm1632_vm9, %v1606_v16  ;;  %v1607_v35 = vadd.f32 %v2018_v8, %v2890_v20 }
 0x1b1   : > { %1637 = vst.msk [vmem:[%s2897_s9 + $0x20] sm:$0xff] %vm1632_vm9, %v1604_v3  ;;  %v1605_v33 = vadd.f32 %v2019_v1, %v2890_v20 }
 0x1b2   : > { %1640 = vst.msk [vmem:[%s2897_s9 + $0x38] sm:$0xff] %vm1632_vm9, %v1607_v35 }
 0x1b3   : > { %1638 = vst.msk [vmem:[%s2897_s9 + $0x28] sm:$0xff] %vm1632_vm9, %v1605_v33  ;;  %v1984_v46 = vpop.f32.mrb[8].mxu0 }
 0x1b4   : > { %v2020_v55 = vadd.f32 %v1984_v46, %v1908_v7  ;;  %v1466_v49 = vpop.f32.mrb[9].mxu0 }
 0x1b5   : > { %v2021_v13 = vadd.f32 %v1466_v49, %v1098_v62  ;;  %v1985_v38 = vpop.f32.mrb[10].mxu0 }
 0x1b6   : > { %v1610_v53 = vadd.f32 %v2020_v55, %v2890_v20  ;;  %v2022_v23 = vadd.f32 %v1985_v38, %v1909_v27  ;;  %v1469_v25 = vpop.f32.mrb[11].mxu0 }
 0x1b7   : > { %v1608_v44 = vadd.f32 %v2021_v13, %v2890_v20  ;;  %v2023_v18 = vadd.f32 %v1469_v25, %v1101_v28 }
 0x1b8   : > { %1643 = vst.msk [vmem:[%s2897_s9 + $0x50] sm:$0xff] %vm1632_vm9, %v1610_v53  ;;  %v1611_v56 = vadd.f32 %v2022_v23, %v2890_v20 }
 0x1b9   : > { %1641 = vst.msk [vmem:[%s2897_s9 + $0x40] sm:$0xff] %vm1632_vm9, %v1608_v44  ;;  %v1609_v57 = vadd.f32 %v2023_v18, %v2890_v20 }
 0x1ba   : > { %1644 = vst.msk [vmem:[%s2897_s9 + $0x58] sm:$0xff] %vm1632_vm9, %v1611_v56 }
 0x1bb   : > { %1642 = vst.msk [vmem:[%s2897_s9 + $0x48] sm:$0xff] %vm1632_vm9, %v1609_v57  ;;  %v1988_v11 = vpop.f32.mrb[12].mxu0 }
 0x1bc   : > { %v2024_v24 = vadd.f32 %v1988_v11, %v1912_v19  ;;  %v1482_v40 = vpop.f32.mrb[13].mxu0 }
 0x1bd   : > { %v2025_v42 = vadd.f32 %v1482_v40, %v1114_v5  ;;  %v1989_v21 = vpop.f32.mrb[14].mxu0 }
 0x1be   : > { %v1614_v39 = vadd.f32 %v2024_v24, %v2890_v20  ;;  %v2026_v29 = vadd.f32 %v1989_v21, %v1913_v26  ;;  %v1485_v10 = vpop.f32.mrb[15].mxu0 }
 0x1bf   : > { %v1612_v48 = vadd.f32 %v2025_v42, %v2890_v20  ;;  %v2027_v4 = vadd.f32 %v1485_v10, %v1117_v45 }
 0x1c0   : > { %1647 = vst.msk [vmem:[%s2897_s9 + $0x70] sm:$0xff] %vm1632_vm9, %v1614_v39  ;;  %v1615_v61 = vadd.f32 %v2026_v29, %v2890_v20 }
 0x1c1   : > { %1645 = vst.msk [vmem:[%s2897_s9 + $0x60] sm:$0xff] %vm1632_vm9, %v1612_v48  ;;  %v1613_v17 = vadd.f32 %v2027_v4, %v2890_v20 }
 0x1c2   : > { %1648 = vst.msk [vmem:[%s2897_s9 + $0x78] sm:$0xff] %vm1632_vm9, %v1615_v61 }
 0x1c3   : > { %1646 = vst.msk [vmem:[%s2897_s9 + $0x68] sm:$0xff] %vm1632_vm9, %v1613_v17  ;;  %v1992_v32 = vpop.f32.mrb[16].mxu0 }
 0x1c4   : > { %v1498_v58 = vpop.f32.mrb[17].mxu0 }
 0x1c5   : > { %v1993_v22 = vpop.f32.mrb[18].mxu0 }
 0x1c6   : > { %v1501_v0 = vpop.f32.mrb[19].mxu0 }
 0x1cb   : > { %v1996_v12 = vpop.f32.mrb[20].mxu0 }
 0x1cc   : > { %v1514_v54 = vpop.f32.mrb[21].mxu0 }
 0x1cd   : > { %v1997_v30 = vpop.f32.mrb[22].mxu0 }
 0x1ce   : > { %v1517_v7 = vpop.f32.mrb[23].mxu0 }
 0x1d3   : > { %v2000_v62 = vpop.f32.mrb[24].mxu0  ;;  %v1954_v27 = vpop.f32.mrb[16].mxu1 }
 0x1d4   : > { %v1530_v28 = vpop.f32.mrb[25].mxu0  ;;  %v2028_v19 = vadd.f32 %v1992_v32, %v1954_v27  ;;  %v1312_v5 = vpop.f32.mrb[17].mxu1 }
 0x1d5   : > { %v2001_v26 = vpop.f32.mrb[26].mxu0  ;;  %v2029_v45 = vadd.f32 %v1498_v58, %v1312_v5  ;;  %v1955_v31 = vpop.f32.mrb[18].mxu1 }
 0x1d6   : > { %v1533_v43 = vpop.f32.mrb[27].mxu0  ;;  %v1618_v63 = vadd.f32 %v2028_v19, %v2890_v20  ;;  %v2030_v41 = vadd.f32 %v1993_v22, %v1955_v31  ;;  %v1315_v60 = vpop.f32.mrb[19].mxu1 }
 0x1d7   : > { %v1616_v34 = vadd.f32 %v2029_v45, %v2890_v20  ;;  %v2031_v50 = vadd.f32 %v1501_v0, %v1315_v60 }
 0x1d8   : > { %1651 = vst.msk [vmem:[%s2897_s9 + $0x90] sm:$0xff] %vm1632_vm9, %v1618_v63  ;;  %v1619_v6 = vadd.f32 %v2030_v41, %v2890_v20 }
 0x1d9   : > { %1649 = vst.msk [vmem:[%s2897_s9 + $0x80] sm:$0xff] %vm1632_vm9, %v1616_v34  ;;  %v1617_v36 = vadd.f32 %v2031_v50, %v2890_v20 }
 0x1da   : > { %1652 = vst.msk [vmem:[%s2897_s9 + $0x98] sm:$0xff] %vm1632_vm9, %v1619_v6 }
 0x1db   : > { %v2004_v52 = vpop.f32.mrb[28].mxu0  ;;  %1650 = vst.msk [vmem:[%s2897_s9 + $0x88] sm:$0xff] %vm1632_vm9, %v1617_v36  ;;  %v1958_v47 = vpop.f32.mrb[20].mxu1 }
 0x1dc   : > { %v1546_v15 = vpop.f32.mrb[29].mxu0  ;;  %v2032_v14 = vadd.f32 %v1996_v12, %v1958_v47  ;;  %v1328_v37 = vpop.f32.mrb[21].mxu1 }
 0x1dd   : > { %v2005_v9 = vpop.f32.mrb[30].mxu0  ;;  %v2033_v51 = vadd.f32 %v1514_v54, %v1328_v37  ;;  %v1959_v59 = vpop.f32.mrb[22].mxu1 }
 0x1de   : > { %v1549_v16 = vpop.f32.mrb[31].mxu0  ;;  %v1622_v8 = vadd.f32 %v2032_v14, %v2890_v20  ;;  %v2034_v2 = vadd.f32 %v1997_v30, %v1959_v59  ;;  %v1331_v3 = vpop.f32.mrb[23].mxu1 }
 0x1df   : > { %v1620_v1 = vadd.f32 %v2033_v51, %v2890_v20  ;;  %v2035_v35 = vadd.f32 %v1517_v7, %v1331_v3 }
 0x1e0   : > { %1655 = vst.msk [vmem:[%s2897_s9 + $0xb0] sm:$0xff] %vm1632_vm9, %v1622_v8  ;;  %v1623_v33 = vadd.f32 %v2034_v2, %v2890_v20 }
 0x1e1   : > { %1653 = vst.msk [vmem:[%s2897_s9 + $0xa0] sm:$0xff] %vm1632_vm9, %v1620_v1  ;;  %v1621_v46 = vadd.f32 %v2035_v35, %v2890_v20 }
 0x1e2   : > { %1656 = vst.msk [vmem:[%s2897_s9 + $0xb8] sm:$0xff] %vm1632_vm9, %v1623_v33 }
 0x1e3   : > { %1654 = vst.msk [vmem:[%s2897_s9 + $0xa8] sm:$0xff] %vm1632_vm9, %v1621_v46  ;;  %v1962_v55 = vpop.f32.mrb[24].mxu1 }
 0x1e4   : > { %v2036_v49 = vadd.f32 %v2000_v62, %v1962_v55  ;;  %v1344_v13 = vpop.f32.mrb[25].mxu1 }
 0x1e5   : > { %v2037_v38 = vadd.f32 %v1530_v28, %v1344_v13  ;;  %v1963_v53 = vpop.f32.mrb[26].mxu1 }
 0x1e6   : > { %v1626_v23 = vadd.f32 %v2036_v49, %v2890_v20  ;;  %v2038_v25 = vadd.f32 %v2001_v26, %v1963_v53  ;;  %v1347_v44 = vpop.f32.mrb[27].mxu1 }
 0x1e7   : > { %v1624_v18 = vadd.f32 %v2037_v38, %v2890_v20  ;;  %v2039_v56 = vadd.f32 %v1533_v43, %v1347_v44 }
 0x1e8   : > { %1659 = vst.msk [vmem:[%s2897_s9 + $0xd0] sm:$0xff] %vm1632_vm9, %v1626_v23  ;;  %v1627_v57 = vadd.f32 %v2038_v25, %v2890_v20 }
 0x1e9   : > { %1657 = vst.msk [vmem:[%s2897_s9 + $0xc0] sm:$0xff] %vm1632_vm9, %v1624_v18  ;;  %v1625_v11 = vadd.f32 %v2039_v56, %v2890_v20 }
 0x1ea   : > { %1660 = vst.msk [vmem:[%s2897_s9 + $0xd8] sm:$0xff] %vm1632_vm9, %v1627_v57 }
 0x1eb   : > { %1658 = vst.msk [vmem:[%s2897_s9 + $0xc8] sm:$0xff] %vm1632_vm9, %v1625_v11  ;;  %v1966_v24 = vpop.f32.mrb[28].mxu1 }
 0x1ec   : > { %v2040_v40 = vadd.f32 %v2004_v52, %v1966_v24  ;;  %v1360_v42 = vpop.f32.mrb[29].mxu1 }
 0x1ed   : > { %v2041_v21 = vadd.f32 %v1546_v15, %v1360_v42  ;;  %v1967_v39 = vpop.f32.mrb[30].mxu1 }
 0x1ee   : > { %v1630_v29 = vadd.f32 %v2040_v40, %v2890_v20  ;;  %v2042_v10 = vadd.f32 %v2005_v9, %v1967_v39  ;;  %v1363_v48 = vpop.f32.mrb[31].mxu1 }
 0x1ef   : > { %v1628_v4 = vadd.f32 %v2041_v21, %v2890_v20  ;;  %v2043_v61 = vadd.f32 %v1549_v16, %v1363_v48 }
 0x1f0   : > { %1663 = vst.msk [vmem:[%s2897_s9 + $0xf0] sm:$0xff] %vm1632_vm9, %v1630_v29  ;;  %v1631_v17 = vadd.f32 %v2042_v10, %v2890_v20 }
 0x1f1   : > { %1661 = vst.msk [vmem:[%s2897_s9 + $0xe0] sm:$0xff] %vm1632_vm9, %v1628_v4  ;;  %v1629_v32 = vadd.f32 %v2043_v61, %v2890_v20 }
 0x1f2   : > { %1664 = vst.msk [vmem:[%s2897_s9 + $0xf8] sm:$0xff] %vm1632_vm9, %v1631_v17 }
 0x1f3   : > { %1662 = vst.msk [vmem:[%s2897_s9 + $0xe8] sm:$0xff] %vm1632_vm9, %v1629_v32 }
 0x1f4 PF: > { %s15_s18 = sadd.s32 1, %s2232_s18  }
 0x1f5   : > { %p12_p4 = scmp.ge.s32.totalorder %s15_s18, 4  }
 0x1f7   :  { %14 = sbr.rel (!%p12_p4) target bundleno = 1 (0x1), region = 72 }

</bundles_post_ra>
